<compile_context>
chip_gen: v7x
topology: tpu7x:2x2x1
jax: 0.10.0
libtpu: 0.0.40
codegen_flags: <defaults>
</compile_context>

<pallas_src>
import functools
import math

import jax
import jax.numpy as jnp
import numpy as np
from jax import lax
from jax.experimental import pallas as pl
from jax.experimental.pallas import tpu as pltpu


def _layer_norm(x, gamma, beta, eps=1e-5):
    mean = jnp.mean(x, axis=-1, keepdims=True)
    var = jnp.mean(jnp.square(x - mean), axis=-1, keepdims=True)
    return (x - mean) * lax.rsqrt(var + eps) * gamma + beta


def _encoder_layer_kernel(
    x_ref,
    wq_ref, bq_ref, wk_ref, bk_ref, wv_ref, bv_ref, wo_ref, bo_ref,
    ln1_g_ref, ln1_b_ref,
    w1_ref, b1_ref, w2_ref, b2_ref,
    ln2_g_ref, ln2_b_ref,
    o_ref,
    *, num_heads, head_dim, scale,
):
    x = x_ref[0]                                        # (S, D) f32
    S, D = x.shape

    # --- multi-head self-attention -------------------------------------------
    q = jnp.dot(x, wq_ref[...], preferred_element_type=jnp.float32) + bq_ref[...]
    k = jnp.dot(x, wk_ref[...], preferred_element_type=jnp.float32) + bk_ref[...]
    v = jnp.dot(x, wv_ref[...], preferred_element_type=jnp.float32) + bv_ref[...]

    acc = jnp.zeros((S, D), jnp.float32)
    for h in range(num_heads):                          # static unroll, H small
        lo, hi = h * head_dim, (h + 1) * head_dim
        qh = q[:, lo:hi]
        kh = k[:, lo:hi]
        vh = v[:, lo:hi]
        # scores[i, j] = <q_i, k_j> / sqrt(head_dim)   (A @ B^T via dot_general)
        scores = lax.dot_general(
            qh, kh, (((1,), (1,)), ((), ())),
            preferred_element_type=jnp.float32) * scale
        scores = scores - jnp.max(scores, axis=-1, keepdims=True)
        p = jnp.exp(scores)
        p = p / jnp.sum(p, axis=-1, keepdims=True)
        oh = jnp.dot(p, vh, preferred_element_type=jnp.float32)
        # head-wise slice of the output projection (rows lo:hi of Wo)
        acc = acc + jnp.dot(oh, wo_ref[lo:hi, :],
                            preferred_element_type=jnp.float32)
    attn_out = acc + bo_ref[...]

    # TODO(synk): dropout / dropout1 / dropout2 are identity here (eval mode); a
    # training-mode kernel would draw masks via pltpu.prng_random_bits.
    h1 = _layer_norm(x + attn_out, ln1_g_ref[...], ln1_b_ref[...])

    # --- position-wise feed-forward -------------------------------------------
    ff = jnp.maximum(
        jnp.dot(h1, w1_ref[...], preferred_element_type=jnp.float32) + b1_ref[...],
        0.0)
    ff = jnp.dot(ff, w2_ref[...], preferred_element_type=jnp.float32) + b2_ref[...]

    out = _layer_norm(h1 + ff, ln2_g_ref[...], ln2_b_ref[...])
    o_ref[0] = out.astype(o_ref.dtype)


def transformer_encoder_layer(src, params, num_heads):
    """Pallas forward pass of MyTransformerEncoderLayer (eval mode).

    src:    (batch, seq, d_model) f32
    params: dict of weights with Linear weights already in (in, out) layout.
    """
    B, S, D = src.shape
    head_dim = D // num_heads
    assert head_dim * num_heads == D, "d_model must be divisible by num_heads"
    scale = 1.0 / math.sqrt(head_dim)

    def row(v):  # 1-D params -> (1, dim) for clean VMEM layout / broadcasting
        return v.reshape(1, -1)

    args = (
        src,
        params["wq"], row(params["bq"]),
        params["wk"], row(params["bk"]),
        params["wv"], row(params["bv"]),
        params["wo"], row(params["bo"]),
        row(params["ln1_g"]), row(params["ln1_b"]),
        params["w1"], row(params["b1"]),
        params["w2"], row(params["b2"]),
        row(params["ln2_g"]), row(params["ln2_b"]),
    )

    # Activations stream per batch element; weights/biases have a constant
    # index_map so they are fetched once and stay VMEM-resident across the grid.
    in_specs = [pl.BlockSpec((1, S, D), lambda b: (b, 0, 0))]
    in_specs += [pl.BlockSpec(a.shape, lambda b: (0, 0)) for a in args[1:]]

    kernel = functools.partial(
        _encoder_layer_kernel,
        num_heads=num_heads, head_dim=head_dim, scale=scale)

    return pl.pallas_call(
        kernel,
        out_shape=jax.ShapeDtypeStruct((B, S, D), src.dtype),
        grid_spec=pltpu.PrefetchScalarGridSpec(
            num_scalar_prefetch=0,
            grid=(B,),
            in_specs=in_specs,
            out_specs=pl.BlockSpec((1, S, D), lambda b: (b, 0, 0)),
        ),
        compiler_params=pltpu.CompilerParams(
            dimension_semantics=("parallel",),
        ),
    )(*args)


# --------------------------- pure-JAX reference -------------------------------
def reference_encoder_layer(src, params, num_heads):
    B, S, D = src.shape
    Dh = D // num_heads

    def linear(x, w, b):
        return jnp.dot(x, w, precision=lax.Precision.HIGHEST) + b

    def layer_norm(x, g, b, eps=1e-5):
        mean = jnp.mean(x, axis=-1, keepdims=True)
        var = jnp.mean(jnp.square(x - mean), axis=-1, keepdims=True)
        return (x - mean) / jnp.sqrt(var + eps) * g + b

    def split(x):
        return x.reshape(B, S, num_heads, Dh).transpose(0, 2, 1, 3)

    q = split(linear(src, params["wq"], params["bq"]))
    k = split(linear(src, params["wk"], params["bk"]))
    v = split(linear(src, params["wv"], params["bv"]))
    scores = jnp.einsum("bhqd,bhkd->bhqk", q, k,
                        precision=lax.Precision.HIGHEST) / math.sqrt(Dh)
    attn = jax.nn.softmax(scores, axis=-1)
    o = jnp.einsum("bhqk,bhkd->bhqd", attn, v, precision=lax.Precision.HIGHEST)
    o = o.transpose(0, 2, 1, 3).reshape(B, S, D)
    attn_out = linear(o, params["wo"], params["bo"])
    x1 = layer_norm(src + attn_out, params["ln1_g"], params["ln1_b"])
    ff = linear(jax.nn.relu(linear(x1, params["w1"], params["b1"])),
                params["w2"], params["b2"])
    return layer_norm(x1 + ff, params["ln2_g"], params["ln2_b"])


def init_params(key, d_model, dim_feedforward, dtype=jnp.float32):
    keys = jax.random.split(key, 12)

    def lin(kw, kb, fan_in, fan_out):
        bound = 1.0 / math.sqrt(fan_in)
        w = jax.random.uniform(kw, (fan_in, fan_out), dtype, -bound, bound)
        b = jax.random.uniform(kb, (fan_out,), dtype, -bound, bound)
        return w, b

    wq, bq = lin(keys[0], keys[1], d_model, d_model)
    wk, bk = lin(keys[2], keys[3], d_model, d_model)
    wv, bv = lin(keys[4], keys[5], d_model, d_model)
    wo, bo = lin(keys[6], keys[7], d_model, d_model)
    w1, b1 = lin(keys[8], keys[9], d_model, dim_feedforward)
    w2, b2 = lin(keys[10], keys[11], dim_feedforward, d_model)
    return {
        "wq": wq, "bq": bq, "wk": wk, "bk": bk, "wv": wv, "bv": bv,
        "wo": wo, "bo": bo,
        "w1": w1, "b1": b1, "w2": w2, "b2": b2,
        "ln1_g": jnp.ones((d_model,), dtype), "ln1_b": jnp.zeros((d_model,), dtype),
        "ln2_g": jnp.ones((d_model,), dtype), "ln2_b": jnp.zeros((d_model,), dtype),
    }


if __name__ == "__main__":
    key = jax.random.PRNGKey(0)
    k_src, k_params = jax.random.split(key)

    # small shapes; d_model / dim_feedforward are multiples of 128 (lane-dense)
    batch, seq, d_model, nhead, dim_ff = 2, 8, 128, 4, 256
    src = jax.random.normal(k_src, (batch, seq, d_model), dtype=jnp.float32)
    params = init_params(k_params, d_model, dim_ff)

    out = transformer_encoder_layer(src, params, nhead)
    out = jax.block_until_ready(out)

    ref = jax.block_until_ready(reference_encoder_layer(src, params, nhead))
    np.testing.assert_allclose(np.asarray(out), np.asarray(ref),
                               rtol=2e-3, atol=2e-3)
    print("KERNEL_OK")
</pallas_src>

<mosaic_0001>
module attributes {stable_mosaic.version = 11 : i64} {
  func.func @_encoder_layer_kernel(%arg0: i32, %arg1: memref<1x8x128xf32, #tpu.memory_space<vmem>>, %arg2: memref<128x128xf32, #tpu.memory_space<vmem>>, %arg3: memref<1x128xf32, #tpu.memory_space<vmem>>, %arg4: memref<128x128xf32, #tpu.memory_space<vmem>>, %arg5: memref<1x128xf32, #tpu.memory_space<vmem>>, %arg6: memref<128x128xf32, #tpu.memory_space<vmem>>, %arg7: memref<1x128xf32, #tpu.memory_space<vmem>>, %arg8: memref<128x128xf32, #tpu.memory_space<vmem>>, %arg9: memref<1x128xf32, #tpu.memory_space<vmem>>, %arg10: memref<1x128xf32, #tpu.memory_space<vmem>>, %arg11: memref<1x128xf32, #tpu.memory_space<vmem>>, %arg12: memref<128x256xf32, #tpu.memory_space<vmem>>, %arg13: memref<1x256xf32, #tpu.memory_space<vmem>>, %arg14: memref<256x128xf32, #tpu.memory_space<vmem>>, %arg15: memref<1x128xf32, #tpu.memory_space<vmem>>, %arg16: memref<1x128xf32, #tpu.memory_space<vmem>>, %arg17: memref<1x128xf32, #tpu.memory_space<vmem>>, %arg18: memref<1x8x128xf32, #tpu.memory_space<vmem>>) attributes {dimension_semantics = [#tpu.dimension_semantics<parallel>], iteration_bounds = array<i64: 2>, scalar_prefetch = 0 : i64, scratch_operands = 0 : i64, tpu.core_type = #tpu.core_type<tc>, window_params = [{transform_indices = @transform_0, window_bounds = array<i64: 1, 8, 128>}, {pipeline_mode = #tpu.pipeline_mode<synchronous>, transform_indices = @transform_1, window_bounds = array<i64: 128, 128>}, {pipeline_mode = #tpu.pipeline_mode<synchronous>, transform_indices = @transform_2, window_bounds = array<i64: 1, 128>}, {pipeline_mode = #tpu.pipeline_mode<synchronous>, transform_indices = @transform_3, window_bounds = array<i64: 128, 128>}, {pipeline_mode = #tpu.pipeline_mode<synchronous>, transform_indices = @transform_4, window_bounds = array<i64: 1, 128>}, {pipeline_mode = #tpu.pipeline_mode<synchronous>, transform_indices = @transform_5, window_bounds = array<i64: 128, 128>}, {pipeline_mode = #tpu.pipeline_mode<synchronous>, transform_indices = @transform_6, window_bounds = array<i64: 1, 128>}, {pipeline_mode = #tpu.pipeline_mode<synchronous>, transform_indices = @transform_7, window_bounds = array<i64: 128, 128>}, {pipeline_mode = #tpu.pipeline_mode<synchronous>, transform_indices = @transform_8, window_bounds = array<i64: 1, 128>}, {pipeline_mode = #tpu.pipeline_mode<synchronous>, transform_indices = @transform_9, window_bounds = array<i64: 1, 128>}, {pipeline_mode = #tpu.pipeline_mode<synchronous>, transform_indices = @transform_10, window_bounds = array<i64: 1, 128>}, {pipeline_mode = #tpu.pipeline_mode<synchronous>, transform_indices = @transform_11, window_bounds = array<i64: 128, 256>}, {pipeline_mode = #tpu.pipeline_mode<synchronous>, transform_indices = @transform_12, window_bounds = array<i64: 1, 256>}, {pipeline_mode = #tpu.pipeline_mode<synchronous>, transform_indices = @transform_13, window_bounds = array<i64: 256, 128>}, {pipeline_mode = #tpu.pipeline_mode<synchronous>, transform_indices = @transform_14, window_bounds = array<i64: 1, 128>}, {pipeline_mode = #tpu.pipeline_mode<synchronous>, transform_indices = @transform_15, window_bounds = array<i64: 1, 128>}, {pipeline_mode = #tpu.pipeline_mode<synchronous>, transform_indices = @transform_16, window_bounds = array<i64: 1, 128>}, {transform_indices = @transform_17, window_bounds = array<i64: 1, 8, 128>}]} {
    %c0 = arith.constant 0 : index
    %c0_0 = arith.constant 0 : index
    %c0_1 = arith.constant 0 : index
    %0 = vector.load %arg1[%c0, %c0_0, %c0_1] : memref<1x8x128xf32, #tpu.memory_space<vmem>>, vector<1x8x128xf32>
    %1 = vector.shape_cast %0 : vector<1x8x128xf32> to vector<8x128xf32>
    %c0_2 = arith.constant 0 : index
    %c0_3 = arith.constant 0 : index
    %2 = vector.load %arg2[%c0_2, %c0_3] : memref<128x128xf32, #tpu.memory_space<vmem>>, vector<128x128xf32>
    %cst = arith.constant dense<0.000000e+00> : vector<8x128xf32>
    %3 = tpu.matmul %1, %2, %cst {dimension_numbers = #tpu.dot_dimension_numbers<[1], [0], [0], [1], [0, 0, 1, 1], [], []>} : vector<8x128xf32>, vector<128x128xf32>, vector<8x128xf32> -> vector<8x128xf32>
    %c0_4 = arith.constant 0 : index
    %c0_5 = arith.constant 0 : index
    %4 = vector.load %arg3[%c0_4, %c0_5] : memref<1x128xf32, #tpu.memory_space<vmem>>, vector<1x128xf32>
    %5 = vector.broadcast %4 : vector<1x128xf32> to vector<8x128xf32>
    %6 = arith.addf %3, %5 : vector<8x128xf32>
    %c0_6 = arith.constant 0 : index
    %c0_7 = arith.constant 0 : index
    %7 = vector.load %arg4[%c0_6, %c0_7] : memref<128x128xf32, #tpu.memory_space<vmem>>, vector<128x128xf32>
    %cst_8 = arith.constant dense<0.000000e+00> : vector<8x128xf32>
    %8 = tpu.matmul %1, %7, %cst_8 {dimension_numbers = #tpu.dot_dimension_numbers<[1], [0], [0], [1], [0, 0, 1, 1], [], []>} : vector<8x128xf32>, vector<128x128xf32>, vector<8x128xf32> -> vector<8x128xf32>
    %c0_9 = arith.constant 0 : index
    %c0_10 = arith.constant 0 : index
    %9 = vector.load %arg5[%c0_9, %c0_10] : memref<1x128xf32, #tpu.memory_space<vmem>>, vector<1x128xf32>
    %10 = vector.broadcast %9 : vector<1x128xf32> to vector<8x128xf32>
    %11 = arith.addf %8, %10 : vector<8x128xf32>
    %c0_11 = arith.constant 0 : index
    %c0_12 = arith.constant 0 : index
    %12 = vector.load %arg6[%c0_11, %c0_12] : memref<128x128xf32, #tpu.memory_space<vmem>>, vector<128x128xf32>
    %cst_13 = arith.constant dense<0.000000e+00> : vector<8x128xf32>
    %13 = tpu.matmul %1, %12, %cst_13 {dimension_numbers = #tpu.dot_dimension_numbers<[1], [0], [0], [1], [0, 0, 1, 1], [], []>} : vector<8x128xf32>, vector<128x128xf32>, vector<8x128xf32> -> vector<8x128xf32>
    %c0_14 = arith.constant 0 : index
    %c0_15 = arith.constant 0 : index
    %14 = vector.load %arg7[%c0_14, %c0_15] : memref<1x128xf32, #tpu.memory_space<vmem>>, vector<1x128xf32>
    %15 = vector.broadcast %14 : vector<1x128xf32> to vector<8x128xf32>
    %16 = arith.addf %13, %15 : vector<8x128xf32>
    %cst_16 = arith.constant 0.000000e+00 : f32
    %17 = vector.broadcast %cst_16 : f32 to vector<8x128xf32>
    %18 = vector.extract_strided_slice %6 {offsets = [0, 0], sizes = [8, 32], strides = [1, 1]} : vector<8x128xf32> to vector<8x32xf32>
    %19 = vector.extract_strided_slice %11 {offsets = [0, 0], sizes = [8, 32], strides = [1, 1]} : vector<8x128xf32> to vector<8x32xf32>
    %20 = vector.extract_strided_slice %16 {offsets = [0, 0], sizes = [8, 32], strides = [1, 1]} : vector<8x128xf32> to vector<8x32xf32>
    %cst_17 = arith.constant dense<0.000000e+00> : vector<8x8xf32>
    %21 = tpu.matmul %18, %19, %cst_17 {dimension_numbers = #tpu.dot_dimension_numbers<[1], [1], [0], [0], [0, 0, 1, 0], [], []>} : vector<8x32xf32>, vector<8x32xf32>, vector<8x8xf32> -> vector<8x8xf32>
    %cst_18 = arith.constant 0.176776692 : f32
    %22 = vector.broadcast %cst_18 : f32 to vector<8x8xf32>
    %23 = arith.mulf %21, %22 : vector<8x8xf32>
    %cst_19 = arith.constant dense<0xFF800000> : vector<8xf32>
    %24 = vector.multi_reduction <maximumf>, %23, %cst_19 [1] : vector<8x8xf32> to vector<8xf32>
    %25 = vector.shape_cast %24 : vector<8xf32> to vector<8x1xf32>
    %26 = vector.broadcast %25 : vector<8x1xf32> to vector<8x8xf32>
    %27 = arith.subf %23, %26 : vector<8x8xf32>
    %28 = math.exp %27 : vector<8x8xf32>
    %cst_20 = arith.constant dense<0.000000e+00> : vector<8xf32>
    %29 = vector.multi_reduction <add>, %28, %cst_20 [1] : vector<8x8xf32> to vector<8xf32>
    %30 = vector.shape_cast %29 : vector<8xf32> to vector<8x1xf32>
    %31 = vector.broadcast %30 : vector<8x1xf32> to vector<8x8xf32>
    %32 = arith.divf %28, %31 : vector<8x8xf32>
    %cst_21 = arith.constant dense<0.000000e+00> : vector<8x32xf32>
    %33 = tpu.matmul %32, %20, %cst_21 {dimension_numbers = #tpu.dot_dimension_numbers<[1], [0], [0], [1], [0, 0, 1, 1], [], []>} : vector<8x8xf32>, vector<8x32xf32>, vector<8x32xf32> -> vector<8x32xf32>
    %c0_22 = arith.constant 0 : index
    %c0_23 = arith.constant 0 : index
    %34 = vector.load %arg8[%c0_22, %c0_23] : memref<128x128xf32, #tpu.memory_space<vmem>>, vector<32x128xf32>
    %cst_24 = arith.constant dense<0.000000e+00> : vector<8x128xf32>
    %35 = tpu.matmul %33, %34, %cst_24 {dimension_numbers = #tpu.dot_dimension_numbers<[1], [0], [0], [1], [0, 0, 1, 1], [], []>} : vector<8x32xf32>, vector<32x128xf32>, vector<8x128xf32> -> vector<8x128xf32>
    %36 = arith.addf %17, %35 : vector<8x128xf32>
    %37 = vector.extract_strided_slice %6 {offsets = [0, 32], sizes = [8, 32], strides = [1, 1]} : vector<8x128xf32> to vector<8x32xf32>
    %38 = vector.extract_strided_slice %11 {offsets = [0, 32], sizes = [8, 32], strides = [1, 1]} : vector<8x128xf32> to vector<8x32xf32>
    %39 = vector.extract_strided_slice %16 {offsets = [0, 32], sizes = [8, 32], strides = [1, 1]} : vector<8x128xf32> to vector<8x32xf32>
    %cst_25 = arith.constant dense<0.000000e+00> : vector<8x8xf32>
    %40 = tpu.matmul %37, %38, %cst_25 {dimension_numbers = #tpu.dot_dimension_numbers<[1], [1], [0], [0], [0, 0, 1, 0], [], []>} : vector<8x32xf32>, vector<8x32xf32>, vector<8x8xf32> -> vector<8x8xf32>
    %cst_26 = arith.constant 0.176776692 : f32
    %41 = vector.broadcast %cst_26 : f32 to vector<8x8xf32>
    %42 = arith.mulf %40, %41 : vector<8x8xf32>
    %cst_27 = arith.constant dense<0xFF800000> : vector<8xf32>
    %43 = vector.multi_reduction <maximumf>, %42, %cst_27 [1] : vector<8x8xf32> to vector<8xf32>
    %44 = vector.shape_cast %43 : vector<8xf32> to vector<8x1xf32>
    %45 = vector.broadcast %44 : vector<8x1xf32> to vector<8x8xf32>
    %46 = arith.subf %42, %45 : vector<8x8xf32>
    %47 = math.exp %46 : vector<8x8xf32>
    %cst_28 = arith.constant dense<0.000000e+00> : vector<8xf32>
    %48 = vector.multi_reduction <add>, %47, %cst_28 [1] : vector<8x8xf32> to vector<8xf32>
    %49 = vector.shape_cast %48 : vector<8xf32> to vector<8x1xf32>
    %50 = vector.broadcast %49 : vector<8x1xf32> to vector<8x8xf32>
    %51 = arith.divf %47, %50 : vector<8x8xf32>
    %cst_29 = arith.constant dense<0.000000e+00> : vector<8x32xf32>
    %52 = tpu.matmul %51, %39, %cst_29 {dimension_numbers = #tpu.dot_dimension_numbers<[1], [0], [0], [1], [0, 0, 1, 1], [], []>} : vector<8x8xf32>, vector<8x32xf32>, vector<8x32xf32> -> vector<8x32xf32>
    %c32 = arith.constant 32 : index
    %c0_30 = arith.constant 0 : index
    %53 = vector.load %arg8[%c32, %c0_30] : memref<128x128xf32, #tpu.memory_space<vmem>>, vector<32x128xf32>
    %cst_31 = arith.constant dense<0.000000e+00> : vector<8x128xf32>
    %54 = tpu.matmul %52, %53, %cst_31 {dimension_numbers = #tpu.dot_dimension_numbers<[1], [0], [0], [1], [0, 0, 1, 1], [], []>} : vector<8x32xf32>, vector<32x128xf32>, vector<8x128xf32> -> vector<8x128xf32>
    %55 = arith.addf %36, %54 : vector<8x128xf32>
    %56 = vector.extract_strided_slice %6 {offsets = [0, 64], sizes = [8, 32], strides = [1, 1]} : vector<8x128xf32> to vector<8x32xf32>
    %57 = vector.extract_strided_slice %11 {offsets = [0, 64], sizes = [8, 32], strides = [1, 1]} : vector<8x128xf32> to vector<8x32xf32>
    %58 = vector.extract_strided_slice %16 {offsets = [0, 64], sizes = [8, 32], strides = [1, 1]} : vector<8x128xf32> to vector<8x32xf32>
    %cst_32 = arith.constant dense<0.000000e+00> : vector<8x8xf32>
    %59 = tpu.matmul %56, %57, %cst_32 {dimension_numbers = #tpu.dot_dimension_numbers<[1], [1], [0], [0], [0, 0, 1, 0], [], []>} : vector<8x32xf32>, vector<8x32xf32>, vector<8x8xf32> -> vector<8x8xf32>
    %cst_33 = arith.constant 0.176776692 : f32
    %60 = vector.broadcast %cst_33 : f32 to vector<8x8xf32>
    %61 = arith.mulf %59, %60 : vector<8x8xf32>
    %cst_34 = arith.constant dense<0xFF800000> : vector<8xf32>
    %62 = vector.multi_reduction <maximumf>, %61, %cst_34 [1] : vector<8x8xf32> to vector<8xf32>
    %63 = vector.shape_cast %62 : vector<8xf32> to vector<8x1xf32>
    %64 = vector.broadcast %63 : vector<8x1xf32> to vector<8x8xf32>
    %65 = arith.subf %61, %64 : vector<8x8xf32>
    %66 = math.exp %65 : vector<8x8xf32>
    %cst_35 = arith.constant dense<0.000000e+00> : vector<8xf32>
    %67 = vector.multi_reduction <add>, %66, %cst_35 [1] : vector<8x8xf32> to vector<8xf32>
    %68 = vector.shape_cast %67 : vector<8xf32> to vector<8x1xf32>
    %69 = vector.broadcast %68 : vector<8x1xf32> to vector<8x8xf32>
    %70 = arith.divf %66, %69 : vector<8x8xf32>
    %cst_36 = arith.constant dense<0.000000e+00> : vector<8x32xf32>
    %71 = tpu.matmul %70, %58, %cst_36 {dimension_numbers = #tpu.dot_dimension_numbers<[1], [0], [0], [1], [0, 0, 1, 1], [], []>} : vector<8x8xf32>, vector<8x32xf32>, vector<8x32xf32> -> vector<8x32xf32>
    %c64 = arith.constant 64 : index
    %c0_37 = arith.constant 0 : index
    %72 = vector.load %arg8[%c64, %c0_37] : memref<128x128xf32, #tpu.memory_space<vmem>>, vector<32x128xf32>
    %cst_38 = arith.constant dense<0.000000e+00> : vector<8x128xf32>
    %73 = tpu.matmul %71, %72, %cst_38 {dimension_numbers = #tpu.dot_dimension_numbers<[1], [0], [0], [1], [0, 0, 1, 1], [], []>} : vector<8x32xf32>, vector<32x128xf32>, vector<8x128xf32> -> vector<8x128xf32>
    %74 = arith.addf %55, %73 : vector<8x128xf32>
    %75 = vector.extract_strided_slice %6 {offsets = [0, 96], sizes = [8, 32], strides = [1, 1]} : vector<8x128xf32> to vector<8x32xf32>
    %76 = vector.extract_strided_slice %11 {offsets = [0, 96], sizes = [8, 32], strides = [1, 1]} : vector<8x128xf32> to vector<8x32xf32>
    %77 = vector.extract_strided_slice %16 {offsets = [0, 96], sizes = [8, 32], strides = [1, 1]} : vector<8x128xf32> to vector<8x32xf32>
    %cst_39 = arith.constant dense<0.000000e+00> : vector<8x8xf32>
    %78 = tpu.matmul %75, %76, %cst_39 {dimension_numbers = #tpu.dot_dimension_numbers<[1], [1], [0], [0], [0, 0, 1, 0], [], []>} : vector<8x32xf32>, vector<8x32xf32>, vector<8x8xf32> -> vector<8x8xf32>
    %cst_40 = arith.constant 0.176776692 : f32
    %79 = vector.broadcast %cst_40 : f32 to vector<8x8xf32>
    %80 = arith.mulf %78, %79 : vector<8x8xf32>
    %cst_41 = arith.constant dense<0xFF800000> : vector<8xf32>
    %81 = vector.multi_reduction <maximumf>, %80, %cst_41 [1] : vector<8x8xf32> to vector<8xf32>
    %82 = vector.shape_cast %81 : vector<8xf32> to vector<8x1xf32>
    %83 = vector.broadcast %82 : vector<8x1xf32> to vector<8x8xf32>
    %84 = arith.subf %80, %83 : vector<8x8xf32>
    %85 = math.exp %84 : vector<8x8xf32>
    %cst_42 = arith.constant dense<0.000000e+00> : vector<8xf32>
    %86 = vector.multi_reduction <add>, %85, %cst_42 [1] : vector<8x8xf32> to vector<8xf32>
    %87 = vector.shape_cast %86 : vector<8xf32> to vector<8x1xf32>
    %88 = vector.broadcast %87 : vector<8x1xf32> to vector<8x8xf32>
    %89 = arith.divf %85, %88 : vector<8x8xf32>
    %cst_43 = arith.constant dense<0.000000e+00> : vector<8x32xf32>
    %90 = tpu.matmul %89, %77, %cst_43 {dimension_numbers = #tpu.dot_dimension_numbers<[1], [0], [0], [1], [0, 0, 1, 1], [], []>} : vector<8x8xf32>, vector<8x32xf32>, vector<8x32xf32> -> vector<8x32xf32>
    %c96 = arith.constant 96 : index
    %c0_44 = arith.constant 0 : index
    %91 = vector.load %arg8[%c96, %c0_44] : memref<128x128xf32, #tpu.memory_space<vmem>>, vector<32x128xf32>
    %cst_45 = arith.constant dense<0.000000e+00> : vector<8x128xf32>
    %92 = tpu.matmul %90, %91, %cst_45 {dimension_numbers = #tpu.dot_dimension_numbers<[1], [0], [0], [1], [0, 0, 1, 1], [], []>} : vector<8x32xf32>, vector<32x128xf32>, vector<8x128xf32> -> vector<8x128xf32>
    %93 = arith.addf %74, %92 : vector<8x128xf32>
    %c0_46 = arith.constant 0 : index
    %c0_47 = arith.constant 0 : index
    %94 = vector.load %arg9[%c0_46, %c0_47] : memref<1x128xf32, #tpu.memory_space<vmem>>, vector<1x128xf32>
    %95 = vector.broadcast %94 : vector<1x128xf32> to vector<8x128xf32>
    %96 = arith.addf %93, %95 : vector<8x128xf32>
    %97 = arith.addf %1, %96 : vector<8x128xf32>
    %c0_48 = arith.constant 0 : index
    %c0_49 = arith.constant 0 : index
    %98 = vector.load %arg10[%c0_48, %c0_49] : memref<1x128xf32, #tpu.memory_space<vmem>>, vector<1x128xf32>
    %c0_50 = arith.constant 0 : index
    %c0_51 = arith.constant 0 : index
    %99 = vector.load %arg11[%c0_50, %c0_51] : memref<1x128xf32, #tpu.memory_space<vmem>>, vector<1x128xf32>
    %cst_52 = arith.constant dense<0.000000e+00> : vector<8xf32>
    %100 = vector.multi_reduction <add>, %97, %cst_52 [1] : vector<8x128xf32> to vector<8xf32>
    %101 = vector.shape_cast %100 : vector<8xf32> to vector<8x1xf32>
    %cst_53 = arith.constant 1.280000e+02 : f32
    %102 = vector.broadcast %cst_53 : f32 to vector<8x1xf32>
    %103 = arith.divf %101, %102 : vector<8x1xf32>
    %104 = vector.broadcast %103 : vector<8x1xf32> to vector<8x128xf32>
    %105 = arith.subf %97, %104 : vector<8x128xf32>
    %106 = arith.mulf %105, %105 : vector<8x128xf32>
    %cst_54 = arith.constant dense<0.000000e+00> : vector<8xf32>
    %107 = vector.multi_reduction <add>, %106, %cst_54 [1] : vector<8x128xf32> to vector<8xf32>
    %108 = vector.shape_cast %107 : vector<8xf32> to vector<8x1xf32>
    %cst_55 = arith.constant 1.280000e+02 : f32
    %109 = vector.broadcast %cst_55 : f32 to vector<8x1xf32>
    %110 = arith.divf %108, %109 : vector<8x1xf32>
    %111 = vector.broadcast %103 : vector<8x1xf32> to vector<8x128xf32>
    %112 = arith.subf %97, %111 : vector<8x128xf32>
    %cst_56 = arith.constant 9.99999974E-6 : f32
    %113 = vector.broadcast %cst_56 : f32 to vector<8x1xf32>
    %114 = arith.addf %110, %113 : vector<8x1xf32>
    %115 = math.rsqrt %114 : vector<8x1xf32>
    %116 = vector.broadcast %115 : vector<8x1xf32> to vector<8x128xf32>
    %117 = arith.mulf %112, %116 : vector<8x128xf32>
    %118 = vector.broadcast %98 : vector<1x128xf32> to vector<8x128xf32>
    %119 = arith.mulf %117, %118 : vector<8x128xf32>
    %120 = vector.broadcast %99 : vector<1x128xf32> to vector<8x128xf32>
    %121 = arith.addf %119, %120 : vector<8x128xf32>
    %c0_57 = arith.constant 0 : index
    %c0_58 = arith.constant 0 : index
    %122 = vector.load %arg12[%c0_57, %c0_58] : memref<128x256xf32, #tpu.memory_space<vmem>>, vector<128x256xf32>
    %cst_59 = arith.constant dense<0.000000e+00> : vector<8x256xf32>
    %123 = tpu.matmul %121, %122, %cst_59 {dimension_numbers = #tpu.dot_dimension_numbers<[1], [0], [0], [1], [0, 0, 1, 1], [], []>} : vector<8x128xf32>, vector<128x256xf32>, vector<8x256xf32> -> vector<8x256xf32>
    %c0_60 = arith.constant 0 : index
    %c0_61 = arith.constant 0 : index
    %124 = vector.load %arg13[%c0_60, %c0_61] : memref<1x256xf32, #tpu.memory_space<vmem>>, vector<1x256xf32>
    %125 = vector.broadcast %124 : vector<1x256xf32> to vector<8x256xf32>
    %126 = arith.addf %123, %125 : vector<8x256xf32>
    %cst_62 = arith.constant 0.000000e+00 : f32
    %127 = vector.broadcast %cst_62 : f32 to vector<8x256xf32>
    %128 = arith.maximumf %126, %127 : vector<8x256xf32>
    %c0_63 = arith.constant 0 : index
    %c0_64 = arith.constant 0 : index
    %129 = vector.load %arg14[%c0_63, %c0_64] : memref<256x128xf32, #tpu.memory_space<vmem>>, vector<256x128xf32>
    %cst_65 = arith.constant dense<0.000000e+00> : vector<8x128xf32>
    %130 = tpu.matmul %128, %129, %cst_65 {dimension_numbers = #tpu.dot_dimension_numbers<[1], [0], [0], [1], [0, 0, 1, 1], [], []>} : vector<8x256xf32>, vector<256x128xf32>, vector<8x128xf32> -> vector<8x128xf32>
    %c0_66 = arith.constant 0 : index
    %c0_67 = arith.constant 0 : index
    %131 = vector.load %arg15[%c0_66, %c0_67] : memref<1x128xf32, #tpu.memory_space<vmem>>, vector<1x128xf32>
    %132 = vector.broadcast %131 : vector<1x128xf32> to vector<8x128xf32>
    %133 = arith.addf %130, %132 : vector<8x128xf32>
    %134 = arith.addf %121, %133 : vector<8x128xf32>
    %c0_68 = arith.constant 0 : index
    %c0_69 = arith.constant 0 : index
    %135 = vector.load %arg16[%c0_68, %c0_69] : memref<1x128xf32, #tpu.memory_space<vmem>>, vector<1x128xf32>
    %c0_70 = arith.constant 0 : index
    %c0_71 = arith.constant 0 : index
    %136 = vector.load %arg17[%c0_70, %c0_71] : memref<1x128xf32, #tpu.memory_space<vmem>>, vector<1x128xf32>
    %cst_72 = arith.constant dense<0.000000e+00> : vector<8xf32>
    %137 = vector.multi_reduction <add>, %134, %cst_72 [1] : vector<8x128xf32> to vector<8xf32>
    %138 = vector.shape_cast %137 : vector<8xf32> to vector<8x1xf32>
    %cst_73 = arith.constant 1.280000e+02 : f32
    %139 = vector.broadcast %cst_73 : f32 to vector<8x1xf32>
    %140 = arith.divf %138, %139 : vector<8x1xf32>
    %141 = vector.broadcast %140 : vector<8x1xf32> to vector<8x128xf32>
    %142 = arith.subf %134, %141 : vector<8x128xf32>
    %143 = arith.mulf %142, %142 : vector<8x128xf32>
    %cst_74 = arith.constant dense<0.000000e+00> : vector<8xf32>
    %144 = vector.multi_reduction <add>, %143, %cst_74 [1] : vector<8x128xf32> to vector<8xf32>
    %145 = vector.shape_cast %144 : vector<8xf32> to vector<8x1xf32>
    %cst_75 = arith.constant 1.280000e+02 : f32
    %146 = vector.broadcast %cst_75 : f32 to vector<8x1xf32>
    %147 = arith.divf %145, %146 : vector<8x1xf32>
    %148 = vector.broadcast %140 : vector<8x1xf32> to vector<8x128xf32>
    %149 = arith.subf %134, %148 : vector<8x128xf32>
    %cst_76 = arith.constant 9.99999974E-6 : f32
    %150 = vector.broadcast %cst_76 : f32 to vector<8x1xf32>
    %151 = arith.addf %147, %150 : vector<8x1xf32>
    %152 = math.rsqrt %151 : vector<8x1xf32>
    %153 = vector.broadcast %152 : vector<8x1xf32> to vector<8x128xf32>
    %154 = arith.mulf %149, %153 : vector<8x128xf32>
    %155 = vector.broadcast %135 : vector<1x128xf32> to vector<8x128xf32>
    %156 = arith.mulf %154, %155 : vector<8x128xf32>
    %157 = vector.broadcast %136 : vector<1x128xf32> to vector<8x128xf32>
    %158 = arith.addf %156, %157 : vector<8x128xf32>
    %c0_77 = arith.constant 0 : index
    %c0_78 = arith.constant 0 : index
    %c0_79 = arith.constant 0 : index
    %159 = vector.load %arg18[%c0_77, %c0_78, %c0_79] : memref<1x8x128xf32, #tpu.memory_space<vmem>>, vector<1x8x128xf32>
    %160 = vector.shape_cast %159 : vector<1x8x128xf32> to vector<8x128xf32>
    %161 = vector.shape_cast %158 : vector<8x128xf32> to vector<1x8x128xf32>
    tpu.vector_store %arg18[%c0_77, %c0_78, %c0_79], %161 {strides = array<i32>} : memref<1x8x128xf32, #tpu.memory_space<vmem>>, vector<1x8x128xf32>,
    return
  }
  func.func @transform_0(%arg0: i32) -> (i32, i32, i32) {
    %c0_i32 = arith.constant 0 : i32
    %c0_i32_0 = arith.constant 0 : i32
    %c0_i32_1 = arith.constant 0 : i32
    return %arg0, %c0_i32, %c0_i32_0 : i32, i32, i32
  }
  func.func @transform_1(%arg0: i32) -> (i32, i32) {
    %c0_i32 = arith.constant 0 : i32
    %c0_i32_0 = arith.constant 0 : i32
    %c0_i32_1 = arith.constant 0 : i32
    return %c0_i32, %c0_i32_0 : i32, i32
  }
  func.func @transform_2(%arg0: i32) -> (i32, i32) {
    %c0_i32 = arith.constant 0 : i32
    %c0_i32_0 = arith.constant 0 : i32
    %c0_i32_1 = arith.constant 0 : i32
    return %c0_i32, %c0_i32_0 : i32, i32
  }
  func.func @transform_3(%arg0: i32) -> (i32, i32) {
    %c0_i32 = arith.constant 0 : i32
    %c0_i32_0 = arith.constant 0 : i32
    %c0_i32_1 = arith.constant 0 : i32
    return %c0_i32, %c0_i32_0 : i32, i32
  }
  func.func @transform_4(%arg0: i32) -> (i32, i32) {
    %c0_i32 = arith.constant 0 : i32
    %c0_i32_0 = arith.constant 0 : i32
    %c0_i32_1 = arith.constant 0 : i32
    return %c0_i32, %c0_i32_0 : i32, i32
  }
  func.func @transform_5(%arg0: i32) -> (i32, i32) {
    %c0_i32 = arith.constant 0 : i32
    %c0_i32_0 = arith.constant 0 : i32
    %c0_i32_1 = arith.constant 0 : i32
    return %c0_i32, %c0_i32_0 : i32, i32
  }
  func.func @transform_6(%arg0: i32) -> (i32, i32) {
    %c0_i32 = arith.constant 0 : i32
    %c0_i32_0 = arith.constant 0 : i32
    %c0_i32_1 = arith.constant 0 : i32
    return %c0_i32, %c0_i32_0 : i32, i32
  }
  func.func @transform_7(%arg0: i32) -> (i32, i32) {
    %c0_i32 = arith.constant 0 : i32
    %c0_i32_0 = arith.constant 0 : i32
    %c0_i32_1 = arith.constant 0 : i32
    return %c0_i32, %c0_i32_0 : i32, i32
  }
  func.func @transform_8(%arg0: i32) -> (i32, i32) {
    %c0_i32 = arith.constant 0 : i32
    %c0_i32_0 = arith.constant 0 : i32
    %c0_i32_1 = arith.constant 0 : i32
    return %c0_i32, %c0_i32_0 : i32, i32
  }
  func.func @transform_9(%arg0: i32) -> (i32, i32) {
    %c0_i32 = arith.constant 0 : i32
    %c0_i32_0 = arith.constant 0 : i32
    %c0_i32_1 = arith.constant 0 : i32
    return %c0_i32, %c0_i32_0 : i32, i32
  }
  func.func @transform_10(%arg0: i32) -> (i32, i32) {
    %c0_i32 = arith.constant 0 : i32
    %c0_i32_0 = arith.constant 0 : i32
    %c0_i32_1 = arith.constant 0 : i32
    return %c0_i32, %c0_i32_0 : i32, i32
  }
  func.func @transform_11(%arg0: i32) -> (i32, i32) {
    %c0_i32 = arith.constant 0 : i32
    %c0_i32_0 = arith.constant 0 : i32
    %c0_i32_1 = arith.constant 0 : i32
    return %c0_i32, %c0_i32_0 : i32, i32
  }
  func.func @transform_12(%arg0: i32) -> (i32, i32) {
    %c0_i32 = arith.constant 0 : i32
    %c0_i32_0 = arith.constant 0 : i32
    %c0_i32_1 = arith.constant 0 : i32
    return %c0_i32, %c0_i32_0 : i32, i32
  }
  func.func @transform_13(%arg0: i32) -> (i32, i32) {
    %c0_i32 = arith.constant 0 : i32
    %c0_i32_0 = arith.constant 0 : i32
    %c0_i32_1 = arith.constant 0 : i32
    return %c0_i32, %c0_i32_0 : i32, i32
  }
  func.func @transform_14(%arg0: i32) -> (i32, i32) {
    %c0_i32 = arith.constant 0 : i32
    %c0_i32_0 = arith.constant 0 : i32
    %c0_i32_1 = arith.constant 0 : i32
    return %c0_i32, %c0_i32_0 : i32, i32
  }
  func.func @transform_15(%arg0: i32) -> (i32, i32) {
    %c0_i32 = arith.constant 0 : i32
    %c0_i32_0 = arith.constant 0 : i32
    %c0_i32_1 = arith.constant 0 : i32
    return %c0_i32, %c0_i32_0 : i32, i32
  }
  func.func @transform_16(%arg0: i32) -> (i32, i32) {
    %c0_i32 = arith.constant 0 : i32
    %c0_i32_0 = arith.constant 0 : i32
    %c0_i32_1 = arith.constant 0 : i32
    return %c0_i32, %c0_i32_0 : i32, i32
  }
  func.func @transform_17(%arg0: i32) -> (i32, i32, i32) {
    %c0_i32 = arith.constant 0 : i32
    %c0_i32_0 = arith.constant 0 : i32
    %c0_i32_1 = arith.constant 0 : i32
    return %arg0, %c0_i32, %c0_i32_0 : i32, i32, i32
  }
}

</mosaic_0001>

<bundles_post_ra>
// kernel: tpu_custom_call.1
= control target key start
LH: loop header
LB: loop body
LE: loop exit
PB: predicated region body
PF: predicated region fallthrough
CT: control target
= control target key end

     0   :  { %s3884_s0 = inlined_call_operand.hbm [shape: f32[2,8,128], index: 0, kind: input, shape index: {}]   ;;  %s3885_s1 = inlined_call_operand.hbm [shape: f32[128,128], index: 1, kind: input, shape index: {}]   ;;  %s3886_s2 = inlined_call_operand.vmem [shape: f32[1,128], index: 2, kind: input, shape index: {}]   ;;  %s3887_s3 = inlined_call_operand.hbm [shape: f32[128,128], index: 3, kind: input, shape index: {}]   ;;  %s3888_s4 = inlined_call_operand.vmem [shape: f32[1,128], index: 4, kind: input, shape index: {}]   ;;  %s3889_s5 = inlined_call_operand.hbm [shape: f32[128,128], index: 5, kind: input, shape index: {}]   ;;  %s3890_s6 = inlined_call_operand.vmem [shape: f32[1,128], index: 6, kind: input, shape index: {}]   ;;  %s3891_s7 = inlined_call_operand.hbm [shape: f32[128,128], index: 7, kind: input, shape index: {}]   ;;  %s3892_s8 = inlined_call_operand.vmem [shape: f32[1,128], index: 8, kind: input, shape index: {}]   ;;  %s3893_s9 = inlined_call_operand.vmem [shape: f32[1,128], index: 9, kind: input, shape index: {}]   ;;  %s3894_s10 = inlined_call_operand.vmem [shape: f32[1,128], index: 10, kind: input, shape index: {}]   ;;  %s3895_s11 = inlined_call_operand.hbm [shape: f32[128,256], index: 11, kind: input, shape index: {}]   ;;  %s3896_s12 = inlined_call_operand.vmem [shape: f32[1,256], index: 12, kind: input, shape index: {}]   ;;  %s3897_s13 = inlined_call_operand.hbm [shape: f32[256,128], index: 13, kind: input, shape index: {}]   ;;  %s3898_s14 = inlined_call_operand.vmem [shape: f32[1,128], index: 14, kind: input, shape index: {}]   ;;  %s3899_s15 = inlined_call_operand.vmem [shape: f32[1,128], index: 15, kind: input, shape index: {}]   ;;  %s3900_s16 = inlined_call_operand.vmem [shape: f32[1,128], index: 16, kind: input, shape index: {}]   ;;  %s3901_s17 = inlined_call_operand.hbm [shape: f32[2,8,128], index: 17, kind: output, shape index: {}]  }
   0x1   :  { %3913 = sst [smem:[#allocation20_spill]] %s3884_s0 }
   0x2   :  { %3914 = sst [smem:[#allocation21_spill]] %s3885_s1 }
   0x3   :  { %3915 = sst [smem:[#allocation22_spill]] %s3886_s2 }
   0x4   :  { %3916 = sst [smem:[#allocation23_spill]] %s3889_s5 }
   0x5   :  { %3917 = sst [smem:[#allocation24_spill]] %s3892_s8 }
   0x6   :  { %3918 = sst [smem:[#allocation25_spill]] %s3893_s9 }
   0x7   :  { %3919 = sst [smem:[#allocation26_spill]] %s3894_s10 }
   0x8   :  { %3920 = sst [smem:[#allocation27_spill]] %s3896_s12 }
   0x9   :  { %3921 = sst [smem:[#allocation28_spill]] %s3898_s14 }
   0xa   :  { %3922 = sst [smem:[#allocation29_spill]] %s3899_s15 }
   0xb   :  { %3923 = sst [smem:[#allocation30_spill]] %s3900_s16 }
   0xc   :  { %3924 = sst [smem:[#allocation31_spill]] %s3901_s17 }
   0xd   :  { %22 = vsyncpa [#allocation3], 0 }
   0xe   :  { %24 = vsyncpa [#allocation3 + $0x1], 0 }
   0xf   :  { %25 = vsyncpa [#allocation6], 0 }
  0x10   :  { %26 = vsyncpa [#allocation9], 0 }
  0x11   :  { %27 = vsyncpa [#allocation12], 0 }
  0x12   :  { %28 = vsyncpa [#allocation4], 0 }
  0x13   :  { %30 = vsyncpa [#allocation4 + $0x1], 0  ;;  %s3379_s24 = smov 0   ;;  %s3381_s25 = smov 0  }
  0x14   :  { %s3383_s26 = smov 0   ;;  %s3385_s27 = smov 0  }
  0x15 LB: > { %s3271_s28 = smov [#allocation5]   ;;  %s3400_s0 = sadd.s32 4294967295, %s3269_s27   ;;  %s3269_s27 = sphi %s3385_s27, %s3961_s27   ;;  %s3265_s26 = sphi %s3383_s26, %s3960_s26   ;;  %s3261_s25 = sphi %s3381_s25, %s3959_s25   ;;  %s3257_s24 = sphi %s3379_s24, %s3958_s24  }
  0x16   : > { %s441_s29 = sshll.u32 %s3271_s28, 4  ;;  %p2337_p0 = scmp.ge.s32.totalorder %s3269_s27, 1  ;;  %s3405_s29 = int_to_ptr.vmem [resolvable:$true] %s441_s29 }
  0x17   : > { %p3910_p1 = scmp.eq.s32.totalorder %s3400_s0, 0  ;;  %p429_p2 = scmp.lt.s32.totalorder %s3269_s27, 3 }
  0x18   : > { %s3272_s18 = smov [#allocation8]   ;;  %s3273_s20 = smov [#allocation11]  }
  0x19   : > { %p3407_p3 = pnand %p2337_p0, %p429_p2  ;;  %s473_s19 = sshll.u32 %s3272_s18, 4  ;;  %s3420_s19 = int_to_ptr.vmem [resolvable:$true] %s473_s19 }
  0x1a   : > { %s511_s21 = sshll.u32 %s3273_s20, 4  ;;  %s3927_s28 = sld [smem:[#allocation21_spill]]  ;;  %s3422_s21 = int_to_ptr.vmem [resolvable:$true] %s511_s21 }
  0x1b   : > { %s3925_s30 = scalar_select %p3407_p3, 1, 0 }
  0x1c   : > { %p2884_p5 = pneg %p3407_p3 }
  0x1e   : > { %p3416_p6 = pnand %p2884_p5, %p3910_p1 }
  0x20   : > { %s2993_s17 = scalar_lea.hbm %s3927_s28, 2048  ;;  %p3432_p8 = pneg %p3416_p6 }
  0x21   : > { %p2994_p7 = scmp.ne.s32.totalorder %s3927_s28, %s2993_s17  ;;  %p3000_p11 = scmp.lt.u32.totalorder %s2993_s17, %s3927_s28 }
  0x23   : > { %p2996_p9 = pnand %p3432_p8, %p2994_p7 }
  0x25   : > { %p2997_p10 = pneg %p2996_p9 }
  0x27   : > { %p3002_p12 = pnand %p3000_p11, %p2997_p10 }
  0x29   : > { %3005 = shalt.err (!%p3002_p12)
}
  0x2a   : > { %s3006_s15 = scalar_lea.vmem %s3405_s29, 2048  ;;  %p3014_p5 = scmp.lt.s32.totalorder %s3405_s29, %s3405_s29 }
  0x2b   : > { %p3007_p13 = scmp.ne.s32.totalorder %s3405_s29, %s3006_s15  ;;  %p3015_p4 = scmp.lt.s32.totalorder %s3006_s15, %s3006_s15 }
  0x2d   : > { %p3009_p0 = pnand %p3007_p13, %p3432_p8  ;;  %p3016_p7 = por %p3015_p4, %p3014_p5 }
  0x2f   : > { %p3010_p2 = pneg %p3009_p0 }
  0x31   : > { %p3017_p9 = pnand %p3016_p7, %p3010_p2 }
  0x33   : > { %3020 = shalt.err (!%p3017_p9)
}
  0x34   : > { %s3905_s16 = smov 128   ;;  %s3907_s14 = smov 8  }
  0x35   : > { %2887 = dma.hbm_to_vmem [thread:$0]  (!%p3416_p6), %s3927_s28, 2048, %s3405_s29, [#allocation6], %s3905_s16, %s3905_s16, %s3907_s14  }
  0x36   : > { %s3929_s5 = sld [smem:[#allocation23_spill]] }
  0x3c   : > { %s3021_s15 = scalar_lea.hbm %s3929_s5, 2048 }
  0x3d   : > { %p3022_p4 = scmp.ne.s32.totalorder %s3929_s5, %s3021_s15  ;;  %p3028_p12 = scmp.lt.u32.totalorder %s3021_s15, %s3929_s5 }
  0x3f   : > { %p3024_p10 = pnand %p3022_p4, %p3432_p8 }
  0x41   : > { %p3025_p11 = pneg %p3024_p10 }
  0x43   : > { %p3030_p13 = pnand %p3028_p12, %p3025_p11 }
  0x45   : > { %3033 = shalt.err (!%p3030_p13)
}
  0x46   : > { %s3034_s29 = scalar_lea.vmem %s3420_s19, 2048  ;;  %p3042_p7 = scmp.lt.s32.totalorder %s3420_s19, %s3420_s19 }
  0x47   : > { %p3035_p0 = scmp.ne.s32.totalorder %s3420_s19, %s3034_s29  ;;  %p3043_p9 = scmp.lt.s32.totalorder %s3034_s29, %s3034_s29 }
  0x49   : > { %p3037_p2 = pnand %p3035_p0, %p3432_p8  ;;  %p3044_p4 = por %p3043_p9, %p3042_p7 }
  0x4b   : > { %p3038_p5 = pneg %p3037_p2 }
  0x4d   : > { %p3045_p10 = pnand %p3044_p4, %p3038_p5 }
  0x4f   : > { %3048 = shalt.err (!%p3045_p10)
}
  0x50   : > { %2893 = dma.hbm_to_vmem [thread:$0]  (!%p3416_p6), %s3929_s5, 2048, %s3420_s19, [#allocation9], %s3905_s16, %s3905_s16, %s3907_s14  }
  0x51   : > { %s3049_s17 = scalar_lea.hbm %s3895_s11, 4096 }
  0x52   : > { %p3050_p11 = scmp.ne.s32.totalorder %s3895_s11, %s3049_s17  ;;  %p3056_p0 = scmp.lt.u32.totalorder %s3049_s17, %s3895_s11 }
  0x54   : > { %p3052_p12 = pnand %p3050_p11, %p3432_p8 }
  0x56   : > { %p3053_p13 = pneg %p3052_p12 }
  0x58   : > { %p3058_p2 = pnand %p3056_p0, %p3053_p13 }
  0x5a   : > { %3061 = shalt.err (!%p3058_p2)
}
  0x5b   : > { %s3062_s19 = scalar_lea.vmem %s3422_s21, 4096  ;;  %p3070_p4 = scmp.lt.s32.totalorder %s3422_s21, %s3422_s21 }
  0x5c   : > { %p3063_p5 = scmp.ne.s32.totalorder %s3422_s21, %s3062_s19  ;;  %p3071_p10 = scmp.lt.s32.totalorder %s3062_s19, %s3062_s19 }
  0x5e   : > { %p3065_p7 = pnand %p3063_p5, %p3432_p8  ;;  %p3072_p11 = por %p3071_p10, %p3070_p4 }
  0x60   : > { %p3066_p9 = pneg %p3065_p7 }
  0x62   : > { %p3073_p12 = pnand %p3072_p11, %p3066_p9 }
  0x64   : > { %3076 = shalt.err (!%p3073_p12)
}
  0x65   : > { %s3276_s29 = smov 256   ;;  %s3277_s8 = smov 16  }
  0x66   : > { %2899 = dma.hbm_to_vmem [thread:$0]  (!%p3416_p6), %s3895_s11, 4096, %s3422_s21, [#allocation12], %s3276_s29, %s3276_s29, %s3277_s8  }
  0x67   : > { %s3278_s12 = smov [#allocation7]   ;;  %s3279_s22 = smov [#allocation10]  }
  0x68   : > { %s457_s17 = sshll.u32 %s3278_s12, 4  ;;  %s489_s23 = sshll.u32 %s3279_s22, 4  ;;  %s458_s17 = int_to_ptr.vmem [resolvable:$true] %s457_s17  ;;  %s490_s23 = int_to_ptr.vmem [resolvable:$true] %s489_s23 }
  0x69   : > { %s3077_s19 = scalar_lea.hbm %s3887_s3, 2048 }
  0x6a   : > { %p3078_p13 = scmp.ne.s32.totalorder %s3887_s3, %s3077_s19  ;;  %p3084_p5 = scmp.lt.u32.totalorder %s3077_s19, %s3887_s3 }
  0x6c   : > { %p3080_p0 = pnand %p3078_p13, %p3432_p8 }
  0x6e   : > { %p3081_p2 = pneg %p3080_p0 }
  0x70   : > { %p3086_p7 = pnand %p3084_p5, %p3081_p2 }
  0x72   : > { %3089 = shalt.err (!%p3086_p7)
}
  0x73   : > { %s3090_s21 = scalar_lea.vmem %s458_s17, 2048  ;;  %p3098_p11 = scmp.lt.s32.totalorder %s458_s17, %s458_s17 }
  0x74   : > { %p3091_p9 = scmp.ne.s32.totalorder %s458_s17, %s3090_s21  ;;  %p3099_p12 = scmp.lt.s32.totalorder %s3090_s21, %s3090_s21 }
  0x76   : > { %p3093_p4 = pnand %p3091_p9, %p3432_p8  ;;  %p3100_p1 = por %p3099_p12, %p3098_p11 }
  0x78   : > { %p3094_p10 = pneg %p3093_p4 }
  0x7a   : > { %p3101_p3 = pnand %p3100_p1, %p3094_p10 }
  0x7c   : > { %3104 = shalt.err (!%p3101_p3)
}
  0x7d   : > { %s3930_s16 = smov 8   ;;  %s3931_s14 = smov 128  }
  0x7e   : > { %2890 = dma.hbm_to_vmem [thread:$0]  (!%p3416_p6), %s3887_s3, 2048, %s458_s17, [#allocation6], %s3931_s14, %s3931_s14, %s3930_s16  }
  0x7f   : > { %s3105_s9 = scalar_lea.hbm %s3891_s7, 2048 }
  0x80   : > { %p3106_p1 = scmp.ne.s32.totalorder %s3891_s7, %s3105_s9  ;;  %p3112_p0 = scmp.lt.u32.totalorder %s3105_s9, %s3891_s7 }
  0x82   : > { %p3108_p3 = pnand %p3106_p1, %p3432_p8 }
  0x84   : > { %p3109_p13 = pneg %p3108_p3 }
  0x86   : > { %p3114_p2 = pnand %p3112_p0, %p3109_p13 }
  0x88   : > { %3117 = shalt.err (!%p3114_p2)
}
  0x89   : > { %s3118_s15 = scalar_lea.vmem %s490_s23, 2048  ;;  %p3126_p4 = scmp.lt.s32.totalorder %s490_s23, %s490_s23 }
  0x8a   : > { %p3119_p5 = scmp.ne.s32.totalorder %s490_s23, %s3118_s15  ;;  %p3127_p10 = scmp.lt.s32.totalorder %s3118_s15, %s3118_s15 }
  0x8c   : > { %p3121_p7 = pnand %p3119_p5, %p3432_p8  ;;  %p3128_p11 = por %p3127_p10, %p3126_p4 }
  0x8e   : > { %p3122_p9 = pneg %p3121_p7 }
  0x90   : > { %p3129_p12 = pnand %p3128_p11, %p3122_p9 }
  0x92   : > { %3132 = shalt.err (!%p3129_p12)
}
  0x93   : > { %2896 = dma.hbm_to_vmem [thread:$0]  (!%p3416_p6), %s3891_s7, 2048, %s490_s23, [#allocation9], %s3931_s14, %s3931_s14, %s3930_s16  }
  0x94   : > { %s3280_s21 = smov [#allocation13]   ;;  %s3133_s8 = scalar_lea.hbm %s3897_s13, 4096 }
  0x95   : > { %s527_s5 = sshll.u32 %s3280_s21, 4  ;;  %p3134_p1 = scmp.ne.s32.totalorder %s3897_s13, %s3133_s8  ;;  %s528_s5 = int_to_ptr.vmem [resolvable:$true] %s527_s5 }
  0x96   : > { %p3140_p0 = scmp.lt.u32.totalorder %s3133_s8, %s3897_s13 }
  0x97   : > { %p3136_p3 = pnand %p3134_p1, %p3432_p8 }
  0x99   : > { %p3137_p13 = pneg %p3136_p3 }
  0x9b   : > { %p3142_p2 = pnand %p3140_p0, %p3137_p13 }
  0x9d   : > { %3145 = shalt.err (!%p3142_p2)
}
  0x9e   : > { %s3146_s23 = scalar_lea.vmem %s528_s5, 4096  ;;  %p3154_p4 = scmp.lt.s32.totalorder %s528_s5, %s528_s5 }
  0x9f   : > { %p3147_p5 = scmp.ne.s32.totalorder %s528_s5, %s3146_s23  ;;  %p3155_p10 = scmp.lt.s32.totalorder %s3146_s23, %s3146_s23 }
  0xa1   : > { %p3149_p7 = pnand %p3147_p5, %p3432_p8  ;;  %p3156_p11 = por %p3155_p10, %p3154_p4 }
  0xa3   : > { %p3150_p9 = pneg %p3149_p7 }
  0xa5   : > { %p3157_p12 = pnand %p3156_p11, %p3150_p9 }
  0xa7   : > { %3160 = shalt.err (!%p3157_p12)
}
  0xa8   : > { %2902 = dma.hbm_to_vmem [thread:$0]  (!%p3416_p6), %s3897_s13, 4096, %s528_s5, [#allocation12], %s3931_s14, %s3931_s14, %s3930_s16  }
  0xa9   : > { %s2336_s1 = sadd.s32 4294967294, %s3269_s27   ;;  %s3570_s18 = sadd.s32 1, %s3269_s27  }
  0xaa   : > { %s40_s17 = ssub.s32 %s3269_s27, %s3570_s18  ;;  %s43_s19 = sadd.s32 1, %s3265_s26 }
  0xab   : > { %p41_p8 = scmp.eq.s32.totalorder %s40_s17, 0  ;;  %p50_p1 = scmp.ne.s32.totalorder %s3265_s26, %s3261_s25 }
  0xac   : > { %p51_p3 = scmp.eq.s32.totalorder %s3269_s27, 0  ;;  %p56_p13 = scmp.ne.s32.totalorder %s3261_s25, %s3257_s24 }
  0xad   : > { %s3581_s21 = scalar_select %p41_p8, %s3265_s26, %s43_s19  }
  0xae   : > { %p3583_p0 = por %p51_p3, %p50_p1  ;;  %p3933_p2 = scmp.eq.s32.totalorder %s3400_s0, 0 }
  0xaf   : > { %p416_p5 = scmp.eq.s32.totalorder %s3400_s0, 1  ;;  %p422_p7 = scmp.eq.s32.totalorder %s2336_s1, 1 }
  0xb0   : > { %p3589_p6 = por %p3933_p2, %p56_p13  ;;  %p2917_p9 = scmp.lt.s32.totalorder %s3269_s27, 2 }
  0xb1   : > { %s550_s14 = sand.u32 1, %s3265_s26   ;;  %p3596_p4 = por %p416_p5, %p50_p1 }
  0xb2   : > { %p3600_p10 = por %p422_p7, %p56_p13  ;;  %s2345_s8 = sshll.u32 %s550_s14, 3 }
  0xb3   : > { %s3935_s5 = scalar_select %p3596_p4, 1, 0 }
  0xb4   : > { %s3936_s29 = scalar_select %p3600_p10, 1, 0 }
  0xb5   : > { %s2346_s9 = sshll.u32 %s3269_s27, 7  ;;  %s3937_s22 = sld [smem:[#allocation20_spill]] }
  0xb6   : > { %s554_s20 = scalar_lea.vmem [#allocation2], %s2345_s8  ;;  %p3614_p11 = pnand %p2917_p9, %p3583_p0 }
  0xb7   : > { %s561_s15 = sshll.u32 %s554_s20, 4  ;;  %s551_s17 = scalar_lea.sflag [#allocation3], %s550_s14  ;;  %s3610_s15 = int_to_ptr.vmem [resolvable:$true] %s561_s15 }
  0xb8   : > { %p3163_p8 = pneg %p3614_p11 }
  0xbb   : > { %s3608_s23 = scalar_lea.hbm %s3937_s22, %s2346_s9  ;;  %s3166_s10 = scalar_lea.hbm %s3937_s22, 256 }
  0xbc   : > { %s3161_s19 = scalar_lea.hbm %s3608_s23, 128  ;;  %p3167_p13 = scmp.lt.u32.totalorder %s3608_s23, %s3937_s22 }
  0xbd   : > { %p3162_p12 = scmp.ne.s32.totalorder %s3608_s23, %s3161_s19  ;;  %p3168_p0 = scmp.lt.u32.totalorder %s3166_s10, %s3161_s19 }
  0xbe   : > { %p3170_p5 = scmp.lt.u32.totalorder %s3161_s19, %s3608_s23 }
  0xbf   : > { %p3164_p1 = pnand %p3163_p8, %p3162_p12  ;;  %p3169_p2 = por %p3168_p0, %p3167_p13 }
  0xc1   : > { %p3165_p3 = pneg %p3164_p1  ;;  %p3171_p7 = por %p3170_p5, %p3169_p2 }
  0xc3   : > { %p3172_p9 = pnand %p3171_p7, %p3165_p3 }
  0xc5   : > { %3175 = shalt.err (!%p3172_p9)
}
  0xc6   : > { %s3176_s14 = scalar_lea.vmem %s3610_s15, 128  ;;  %s3281_s20 = smov [#allocation2]  }
  0xc7   : > { %p3177_p12 = scmp.ne.s32.totalorder %s3610_s15, %s3176_s14  ;;  %s3181_s8 = sshll.u32 %s3281_s20, 4  ;;  %s3182_s8 = int_to_ptr.vmem [resolvable:$false] %s3181_s8 }
  0xc8   : > { %s3183_s9 = scalar_lea.vmem %s3182_s8, 256  ;;  %p3184_p4 = scmp.lt.s32.totalorder %s3610_s15, %s3182_s8 }
  0xc9   : > { %p3179_p1 = pnand %p3177_p12, %p3163_p8  ;;  %p3185_p13 = scmp.lt.s32.totalorder %s3183_s9, %s3176_s14 }
  0xcb   : > { %p3180_p10 = pneg %p3179_p1  ;;  %p3186_p0 = por %p3185_p13, %p3184_p4 }
  0xcd   : > { %p3187_p2 = pnand %p3186_p0, %p3180_p10 }
  0xcf   : > { %3190 = shalt.err (!%p3187_p2)
}
  0xd0   : > { %2906 = dma.hbm_to_vmem [thread:$0]  (!%p3614_p11), %s3608_s23, 128, %s3610_s15, %s551_s17  }
  0xd1   : > { %p3939_p3 = scmp.ne.s32.totalorder %s3925_s30, 0 }
  0xd2   : > { %s3646_s19 = sand.u32 (!%p3939_p3), 1, %s3261_s25  }
  0xd3   : > { %570 = sbr.rel (%p3939_p3) target bundleno = 4331 (0x10eb), region = 88  ;;  %s2348_s10 = sshll.u32 (!%p3939_p3), %s3646_s19, 3 }
  0xd4   : > { %s573_s28 = scalar_lea.sflag (!%p3939_p3), [#allocation3], %s3646_s19  ;;  %s3652_s12 = scalar_lea.vmem (!%p3939_p3), [#allocation2], %s2348_s10 }
  0xda   : > { %3236 = dma.done.wait (%p3589_p6), %s573_s28, 128  }
  0xdb   : > { %3238 = vsyncadd (%p3589_p6), %s573_s28, 4294967168  ;;  %p3940_p4 = scmp.eq.s32.totalorder %s3400_s0, 0 }
  0xdd   : > { %3240 = dma.done.wait (%p3940_p4), [#allocation6], 4096   ;;  %p3941_p10 = pmov %p3940_p4 }
  0xde   : > { %p3942_p11 = pmov %p3940_p4 }
  0xdf   : > { %3242 = vsyncadd (%p3941_p10), [#allocation6], 4294963200 }
  0xe0   : > { %3244 = dma.done.wait (%p3942_p11), [#allocation9], 4096   ;;  %p3943_p8 = pmov %p3940_p4 }
  0xe1   : > { %p3944_p5 = pmov %p3940_p4 }
  0xe2   : > { %3246 = vsyncadd (%p3943_p8), [#allocation9], 4294963200 }
  0xe3   : > { %3248 = dma.done.wait (%p3944_p5), [#allocation12], 8192   ;;  %p3945_p7 = pmov %p3940_p4 }
  0xe4   : > { %v3282_v0 = vmov 0.0|0.0   ;;  %vm3283_vm0 = vmmov 0   ;;  %v3284_v1 = vmov 0.0   ;;  %v745_v2 = vld [vmem:[#allocation7] sm:$0xff]  ;;  %v746_v3 = vld [vmem:[#allocation7 + $0x8] sm:$0xff]  ;;  %v747_v7 = vld [vmem:[#allocation7 + $0x10] sm:$0xff] }
  0xe5   : > { %3250 = vsyncadd (%p3945_p7), [#allocation12], 4294959104  ;;  %2720 = vmatprep.subr.bf16.mxu1 %v3282_v0  ;;  %2696 = vmatprep.subr.bf16.mxu0 %v3282_v0  ;;  %v652_v4 = vld [vmem:[#allocation5] sm:$0xff]  ;;  %v2721_v5 = vpack.c.bf16 %v746_v3, %v745_v2  ;;  %v653_v6 = vld [vmem:[#allocation5 + $0x8] sm:$0xff]  ;;  %s3946_s2 = sld [smem:[#allocation22_spill]]  ;;  %vm931_vm1 = vcmask 261120  }
  0xe6   : > { %2574 = vmatprep.mubr.msk.f32.mxu1 %vm3283_vm0, %v3284_v1  ;;  %2539 = vmatprep.mubr.msk.f32.mxu0 %vm3283_vm0, %v3284_v1  ;;  %v748_v8 = vld [vmem:[#allocation7 + $0x18] sm:$0xff]  ;;  %v2697_v9 = vpack.c.bf16 %v653_v6, %v652_v4  ;;  %v654_v10 = vld [vmem:[#allocation5 + $0x10] sm:$0xff]  ;;  %v749_v14 = vld [vmem:[#allocation7 + $0x20] sm:$0xff]  ;;  %s3285_s1 = smov 96   ;;  %vm1009_vm2 = vcmask 64512   ;;  %s3286_s20 = smov 64  }
  0xe7   : > { %v655_v11 = vld [vmem:[#allocation5 + $0x18] sm:$0xff]  ;;  %2722 = vmatpush3.bf16.msra.mxu1 %v2721_v5  ;;  %v2724_v12 = vpack.c.bf16 %v748_v8, %v747_v7  ;;  %v750_v15 = vld [vmem:[#allocation7 + $0x28] sm:$0xff]  ;;  %v656_v16 = vld [vmem:[#allocation5 + $0x20] sm:$0xff]  ;;  %s3287_s8 = smov 32   ;;  %s3948_s23 = sld [smem:[#allocation25_spill]] }
  0xe8   : > { %2698 = vmatpush3.bf16.msra.mxu0 %v2697_v9  ;;  %2723 = vmatprep.subr.bf16.mxu1 %v3282_v0  ;;  %v2700_v13 = vpack.c.bf16 %v655_v11, %v654_v10  ;;  %v657_v17 = vld [vmem:[#allocation5 + $0x28] sm:$0xff]  ;;  %v2727_v18 = vpack.c.bf16 %v750_v15, %v749_v14  ;;  %v751_v20 = vld [vmem:[#allocation7 + $0x30] sm:$0xff]  ;;  %v752_v21 = vld [vmem:[#allocation7 + $0x38] sm:$0xff]  ;;  %s3949_s17 = sld [smem:[#allocation26_spill]]  ;;  %s2382_s14 = sshll.u32 %s3400_s0, 7 }
  0xe9   : > { %2699 = vmatprep.subr.bf16.mxu0 %v3282_v0  ;;  %v2703_v19 = vpack.c.bf16 %v657_v17, %v656_v16  ;;  %v658_v22 = vld [vmem:[#allocation5 + $0x30] sm:$0xff]  ;;  %v659_v23 = vld [vmem:[#allocation5 + $0x38] sm:$0xff]  ;;  %v2730_v24 = vpack.c.bf16 %v752_v21, %v751_v20  ;;  %v753_v26 = vld [vmem:[#allocation7 + $0x40] sm:$0xff]  ;;  %s2196_s30 = scalar_lea.sflag [#allocation4], %s3646_s19  ;;  %p3955_p9 = scmp.ne.s32.totalorder %s3935_s5, 0 }
  0xea   : > { %v2706_v25 = vpack.c.bf16 %v659_v23, %v658_v22  ;;  %v754_v27 = vld [vmem:[#allocation7 + $0x48] sm:$0xff]  ;;  %v660_v28 = vld [vmem:[#allocation5 + $0x40] sm:$0xff]  ;;  %v755_v32 = vld [vmem:[#allocation7 + $0x50] sm:$0xff]  ;;  %s3288_s0 = smov [#allocation14]  }
  0xeb   : > { %2725 = vmatpush3.bf16.msra.mxu1 %v2724_v12  ;;  %v661_v29 = vld [vmem:[#allocation5 + $0x48] sm:$0xff]  ;;  %v2733_v30 = vpack.c.bf16 %v754_v27, %v753_v26  ;;  %v756_v33 = vld [vmem:[#allocation7 + $0x58] sm:$0xff]  ;;  %v662_v34 = vld [vmem:[#allocation5 + $0x50] sm:$0xff] }
  0xec   : > { %2701 = vmatpush3.bf16.msra.mxu0 %v2700_v13  ;;  %2726 = vmatprep.subr.bf16.mxu1 %v3282_v0  ;;  %v2709_v31 = vpack.c.bf16 %v661_v29, %v660_v28  ;;  %v663_v35 = vld [vmem:[#allocation5 + $0x58] sm:$0xff]  ;;  %v2736_v36 = vpack.c.bf16 %v756_v33, %v755_v32  ;;  %v757_v38 = vld [vmem:[#allocation7 + $0x60] sm:$0xff]  ;;  %v758_v39 = vld [vmem:[#allocation7 + $0x68] sm:$0xff] }
  0xed   : > { %2702 = vmatprep.subr.bf16.mxu0 %v3282_v0  ;;  %v2712_v37 = vpack.c.bf16 %v663_v35, %v662_v34  ;;  %v664_v40 = vld [vmem:[#allocation5 + $0x60] sm:$0xff]  ;;  %v665_v41 = vld [vmem:[#allocation5 + $0x68] sm:$0xff]  ;;  %v2739_v42 = vpack.c.bf16 %v758_v39, %v757_v38  ;;  %v759_v44 = vld [vmem:[#allocation7 + $0x70] sm:$0xff] }
  0xee   : > { %v2715_v43 = vpack.c.bf16 %v665_v41, %v664_v40  ;;  %v760_v45 = vld [vmem:[#allocation7 + $0x78] sm:$0xff]  ;;  %v666_v46 = vld [vmem:[#allocation5 + $0x70] sm:$0xff]  ;;  %v838_v59 = vld [vmem:[#allocation8] sm:$0xff] }
  0xef   : > { %2728 = vmatpush3.bf16.msra.mxu1 %v2727_v18  ;;  %v667_v47 = vld [vmem:[#allocation5 + $0x78] sm:$0xff]  ;;  %v2742_v48 = vpack.c.bf16 %v760_v45, %v759_v44  ;;  %v2357_v51 = vld [vmem:[%s3888_s4] ss:$0 sm:$0xff]  ;;  %v839_v60 = vld [vmem:[#allocation8 + $0x8] sm:$0xff] }
  0xf0   : > { %2704 = vmatpush3.bf16.msra.mxu0 %v2703_v19  ;;  %2729 = vmatprep.subr.bf16.mxu1 %v3282_v0  ;;  %v2718_v49 = vpack.c.bf16 %v667_v47, %v666_v46  ;;  %v3691_v50 = vld [vmem:[%s3652_s12] sm:$0xff]  ;;  %v2745_v62 = vpack.c.bf16 %v839_v60, %v838_v59  ;;  %v842_v3 = vld [vmem:[#allocation8 + $0x20] sm:$0xff]  ;;  %v843_v4 = vld [vmem:[#allocation8 + $0x28] sm:$0xff]  ;;  %s3947_s12 = sld [smem:[#allocation24_spill]] }
  0xf1   : > { %2705 = vmatprep.subr.bf16.mxu0 %v3282_v0  ;;  %v2356_v52 = vld [vmem:[%s3946_s2] ss:$0 sm:$0xff]  ;;  %v841_v63 = vld [vmem:[#allocation8 + $0x18] sm:$0xff]  ;;  %v2751_v5 = vpack.c.bf16 %v843_v4, %v842_v3  ;;  %v846_v9 = vld [vmem:[#allocation8 + $0x40] sm:$0xff] }
  0xf2   : > { %v840_v61 = vld [vmem:[#allocation8 + $0x10] sm:$0xff]  ;;  %v845_v7 = vld [vmem:[#allocation8 + $0x38] sm:$0xff]  ;;  %v847_v10 = vld [vmem:[#allocation8 + $0x48] sm:$0xff] }
  0xf3   : > { %2731 = vmatpush3.bf16.msra.mxu1 %v2730_v24  ;;  %v2748_v2 = vpack.c.bf16 %v841_v63, %v840_v61  ;;  %v844_v6 = vld [vmem:[#allocation8 + $0x30] sm:$0xff]  ;;  %v2757_v11 = vpack.c.bf16 %v847_v10, %v846_v9  ;;  %v849_v13 = vld [vmem:[#allocation8 + $0x58] sm:$0xff]  ;;  %v850_v15 = vld [vmem:[#allocation8 + $0x60] sm:$0xff] }
  0xf4   : > { %2707 = vmatpush3.bf16.msra.mxu0 %v2706_v25  ;;  %2732 = vmatprep.subr.bf16.mxu1 %v3282_v0  ;;  %v2754_v8 = vpack.c.bf16 %v845_v7, %v844_v6  ;;  %v848_v12 = vld [vmem:[#allocation8 + $0x50] sm:$0xff]  ;;  %v851_v16 = vld [vmem:[#allocation8 + $0x68] sm:$0xff]  ;;  %v853_v19 = vld [vmem:[#allocation8 + $0x78] sm:$0xff] }
  0xf5   : > { %2708 = vmatprep.subr.bf16.mxu0 %v3282_v0  ;;  %v2760_v14 = vpack.c.bf16 %v849_v13, %v848_v12  ;;  %v2763_v17 = vpack.c.bf16 %v851_v16, %v850_v15  ;;  %v852_v18 = vld [vmem:[#allocation8 + $0x70] sm:$0xff]  ;;  %v1268_v61 = vld [vmem:[#allocation10 + $0x38] sm:$0xff]  ;;  %v1095_v63 = vld [vmem:[#allocation10 + $0x8] sm:$0xff] }
  0xf6   : > { %v2766_v20 = vpack.c.bf16 %v853_v19, %v852_v18  ;;  %v1267_v60 = vld [vmem:[#allocation10 + $0x30] sm:$0xff]  ;;  %v1097_v4 = vld [vmem:[#allocation10 + $0x18] sm:$0xff] }
  0xf7   : > { %2734 = vmatpush3.bf16.msra.mxu1 %v2733_v30  ;;  %v2358_v30 = vld [vmem:[%s3890_s6] ss:$0 sm:$0xff] }
  0xf8   : > { %2710 = vmatpush3.bf16.msra.mxu0 %v2709_v31  ;;  %2735 = vmatprep.subr.bf16.mxu1 %v3282_v0  ;;  %v1096_v3 = vld [vmem:[#allocation10 + $0x10] sm:$0xff] }
  0xf9   : > { %2711 = vmatprep.subr.bf16.mxu0 %v3282_v0  ;;  %v2778_v7 = vpack.c.bf16 %v1097_v4, %v1096_v3 }
  0xfb   : > { %2737 = vmatpush3.bf16.msra.mxu1 %v2736_v36 }
  0xfc   : > { %2713 = vmatpush3.bf16.msra.mxu0 %v2712_v37  ;;  %2738 = vmatprep.subr.bf16.mxu1 %v3282_v0 }
  0xfd   : > { %2714 = vmatprep.subr.bf16.mxu0 %v3282_v0 }
  0xff   : > { %2740 = vmatpush3.bf16.msra.mxu1 %v2739_v42 }
 0x100   : > { %2716 = vmatpush3.bf16.msra.mxu0 %v2715_v43  ;;  %2741 = vmatprep.subr.bf16.mxu1 %v3282_v0 }
 0x101   : > { %2717 = vmatprep.subr.bf16.mxu0 %v3282_v0 }
 0x103   : > { %2743 = vmatpush3.bf16.msra.mxu1 %v2742_v48 }
 0x104   : > { %2719 = vmatpush3.bf16.msra.mxu0 %v2718_v49  ;;  %2612 = vmatprep.subr.mxu1 %v3284_v1 }
 0x105   : > { %2744 = vmatprep.subr.bf16.mxu0 %v3282_v0 }
 0x106   : > { %2575 = vmatmul.mubr.f32.vlgmr.msra.gmra.mrb[0].mxu1 %v3691_v50 }
 0x107   : > { %2540 = vmatmul.mubr.f32.vlgmr.msra.gmra.mrb[0].mxu0 %v3691_v50  ;;  %2614 = vmatprep.mubr.msk.f32.mxu1 %vm3283_vm0, %v3284_v1 }
 0x108   : > { %2609 = vmatprep.mubr.msk.f32.mxu0 %vm3283_vm0, %v3284_v1  ;;  %2746 = vmatpush3.bf16.msra.mxu0 %v2745_v62  ;;  %v2772_v62 = vpack.c.bf16 %v1268_v61, %v1267_v60 }
 0x109   : > { %2747 = vmatprep.subr.bf16.mxu0 %v3282_v0 }
 0x10c   : > { %2749 = vmatpush3.bf16.msra.mxu0 %v2748_v2 }
 0x10d   : > { %2750 = vmatprep.subr.bf16.mxu0 %v3282_v0 }
 0x110   : > { %2752 = vmatpush3.bf16.msra.mxu0 %v2751_v5 }
 0x111   : > { %2753 = vmatprep.subr.bf16.mxu0 %v3282_v0 }
 0x114   : > { %2755 = vmatpush3.bf16.msra.mxu0 %v2754_v8 }
 0x115   : > { %2756 = vmatprep.subr.bf16.mxu0 %v3282_v0 }
 0x118   : > { %2758 = vmatpush3.bf16.msra.mxu0 %v2757_v11 }
 0x119   : > { %2759 = vmatprep.subr.bf16.mxu0 %v3282_v0 }
 0x11c   : > { %2761 = vmatpush3.bf16.msra.mxu0 %v2760_v14 }
 0x11d   : > { %2762 = vmatprep.subr.bf16.mxu0 %v3282_v0 }
 0x120   : > { %2764 = vmatpush3.bf16.msra.mxu0 %v2763_v17 }
 0x121   : > { %2765 = vmatprep.subr.bf16.mxu0 %v3282_v0 }
 0x124   : > { %2767 = vmatpush3.bf16.msra.mxu0 %v2766_v20 }
 0x125   : > { %2780 = vmatprep.subr.bf16.mxu0 %v3282_v0 }
 0x127   : > { %2610 = vmatmul.mubr.f32.vlgmr.msra.gmra.mrb[2].mxu0 %v3691_v50 }
 0x128   : > { %2672 = vmatprep.mubr.msk.f32.mxu0 %vm3283_vm0, %v3284_v1 }
 0x1d9   : > { %v834_v53 = vpop.f32.mrb[0].mxu1 }
 0x1da   : > { %v3707_v54 = vadd.f32 %v2357_v51, %v834_v53  ;;  %v2576_v55 = vpop.f32.mrb[1].mxu1  ;;  %v741_v56 = vpop.f32.mrb[0].mxu0  ;;  %v1265_v53 = vld [vmem:[#allocation10 + $0x20] sm:$0xff] }
 0x1db   : > { %v3709_v57 = vadd.f32 %v2356_v52, %v741_v56  ;;  %v2541_v58 = vpop.f32.mrb[1].mxu0  ;;  %v1266_v55 = vld [vmem:[#allocation10 + $0x28] sm:$0xff] }
 0x1dc   : > { %1100 = vrot.lane.b32.xlu1 %v3707_v54, %s3285_s1  ;;  %2613 = vmatpush3.xpose.msk.msra.mxu1 %vm931_vm1, %v3707_v54  ;;  %v2769_v58 = vpack.c.bf16 %v1266_v55, %v1265_v53  ;;  %v1828_v53 = vld [vmem:[#allocation10 + $0x78] sm:$0xff] }
 0x1dd   : > { %2617 = vmatprep.subr.mxu1 %v3284_v1 }
 0x1df   : > { %2615 = vmatmul.mubr.msk.f32.vlgmr.msra.gmra.mrb[2].mxu1 %vm931_vm1, %v3709_v57 }
 0x1e0   : > { %1098 = vrot.lane.b32.xlu1 %v3709_v57, %s3285_s1  ;;  %2619 = vmatprep.mubr.msk.f32.mxu1 %vm3283_vm0, %v3284_v1 }
 0x1fa   : > { %v927_v31 = vpop.f32.mrb[2].mxu0 }
 0x1fb   : > { %v3738_v32 = vadd.f32 %v2358_v30, %v927_v31  ;;  %v2611_v33 = vpop.f32.mrb[3].mxu0 }
 0x1fd   : > { %2618 = vmatpush3.msra.mxu1 %v3738_v32 }
 0x1fe   : > { %2622 = vmatprep.subr.mxu1 %v3284_v1 }
 0x24e   : > { %v1101_v36 = vpop.permute.xlu1 %1100 }
 0x252   : > { %v1099_v38 = vpop.permute.xlu1 %1098 }
 0x2b2   : > { %v1004_v21 = vpop.f32.mrb[2].mxu1 }
 0x2b3   : > { %v1008_v22 = vmul.f32 0.17677669, %v1004_v21  ;;  %v2616_v23 = vpop.f32.mrb[3].mxu1 }
 0x2b5   : > { %v1010_v24 = vsel %vm1009_vm2, %v1008_v22, -inf }
 0x2b6   : > { %1011 = vmax.xlane.f32.xlu0 %v1010_v24 }
 0x343   : > { %v1012_v25 = vpop.xlane.xlu0 %1011 }
 0x344   : > { %v1013_v26 = vsub.f32 %v1008_v22, %v1012_v25  ;;  %v1581_v25 = vld [vmem:[#allocation10 + $0x40] sm:$0xff] }
 0x346   : > { %v1014_v27 = vmul.f32 1.442695, %v1013_v26  ;;  %v1582_v26 = vld [vmem:[#allocation10 + $0x48] sm:$0xff] }
 0x348   : > { %2973 = vpow2.f32 %v1014_v27  ;;  %v1583_v27 = vld [vmem:[#allocation10 + $0x50] sm:$0xff] }
 0x352   : > { %v2974_v28 = vpop.eup %2973 }
 0x353   : > { %v1016_v29 = vsel %vm1009_vm2, %v2974_v28, 0.0 }
 0x354   : > { %1017 = vadd.xlane.f32.xlu0 %v1016_v29  ;;  %v1584_v29 = vld [vmem:[#allocation10 + $0x58] sm:$0xff] }
 0x355   : > { %v2784_v30 = vpack.c.bf16 %v1584_v29, %v1583_v27  ;;  %v1955_v27 = vld [vmem:[#allocation11 + $0x78] sm:$0xff]  ;;  %v1952_v29 = vld [vmem:[#allocation11 + $0x60] sm:$0xff] }
 0x3e1   : > { %v1018_v34 = vpop.xlane.xlu0 %1017 }
 0x3e2   : > { %2975 = vrcp.f32 %v1018_v34 }
 0x3ec   : > { %v2976_v35 = vpop.eup %2975 }
 0x3ed   : > { %v1020_v37 = vmul.f32 %v2976_v35, %v2974_v28  ;;  %v2781_v28 = vpack.c.bf16 %v1582_v26, %v1581_v25  ;;  %v1953_v26 = vld [vmem:[#allocation11 + $0x68] sm:$0xff] }
 0x3ef   : > { %2620 = vmatmul.mubr.msk.f32.vlgmr.msra.gmra.mrb[4].mxu1 %vm1009_vm2, %v1020_v37  ;;  %2782 = vmatpush3.bf16.msra.mxu0 %v2781_v28  ;;  %v2804_v28 = vpack.c.bf16 %v1955_v27, %v1953_v26  ;;  %v2067_v26 = vld [vmem:[#allocation13 + $0x50] sm:$0xff]  ;;  %v2068_v27 = vld [vmem:[#allocation13 + $0x58] sm:$0xff] }
 0x3f0   : > { %2623 = vmatpush3.xpose.msk.msra.mxu1 %vm931_vm1, %v1101_v36  ;;  %2624 = vmatprep.mubr.msk.f32.mxu1 %vm3283_vm0, %v3284_v1 }
 0x3f1   : > { %2627 = vmatprep.subr.mxu1 %v3284_v1  ;;  %2783 = vmatprep.subr.bf16.mxu0 %v3282_v0 }
 0x3f3   : > { %2625 = vmatmul.mubr.msk.f32.vlgmr.msra.gmra.mrb[6].mxu1 %vm931_vm1, %v1099_v38  ;;  %2785 = vmatpush3.bf16.msra.mxu0 %v2784_v30  ;;  %v1954_v30 = vld [vmem:[#allocation11 + $0x70] sm:$0xff] }
 0x3f4   : > { %2629 = vmatprep.mubr.msk.f32.mxu1 %vm3283_vm0, %v3284_v1  ;;  %2786 = vmatprep.subr.bf16.mxu0 %v3282_v0 }
 0x4c2   : > { %v1090_v39 = vpop.f32.mrb[4].mxu1 }
 0x4c3   : > { %v2621_v40 = vpop.f32.mrb[5].mxu1 }
 0x4c6   : > { %v1172_v41 = vpop.f32.mrb[6].mxu1 }
 0x4c7   : > { %v1176_v42 = vmul.f32 0.17677669, %v1172_v41  ;;  %v2626_v43 = vpop.f32.mrb[7].mxu1 }
 0x4c9   : > { %v1177_v44 = vsel %vm1009_vm2, %v1176_v42, -inf }
 0x4ca   : > { %1178 = vmax.xlane.f32.xlu0 %v1177_v44 }
 0x4e0   : > { %1189 = vrot.lane.b32.xlu0 %v3738_v32, %s3285_s1 }
 0x4e4   : > { %1417 = vrot.lane.b32.xlu0 %v3707_v54, %s3286_s20 }
 0x4e8   : > { %1415 = vrot.lane.b32.xlu0 %v3709_v57, %s3286_s20 }
 0x557   : > { %v1179_v45 = vpop.xlane.xlu0 %1178 }
 0x558   : > { %v1180_v46 = vsub.f32 %v1176_v42, %v1179_v45 }
 0x55a   : > { %v1181_v47 = vmul.f32 1.442695, %v1180_v46 }
 0x55b   : > { %v1190_v48 = vpop.permute.xlu0 %1189 }
 0x55c   : > { %2977 = vpow2.f32 %v1181_v47  ;;  %2628 = vmatpush3.msra.mxu1 %v1190_v48  ;;  %v1825_v48 = vld [vmem:[#allocation10 + $0x60] sm:$0xff] }
 0x55d   : > { %2768 = vmatprep.subr.bf16.mxu1 %v3282_v0 }
 0x55f   : > { %v1418_v8 = vpop.permute.xlu0 %1417 }
 0x563   : > { %v1416_v9 = vpop.permute.xlu0 %1415 }
 0x566   : > { %v2978_v49 = vpop.eup %2977 }
 0x567   : > { %v1183_v51 = vsel %vm1009_vm2, %v2978_v49, 0.0 }
 0x568   : > { %1184 = vadd.xlane.f32.xlu1 %v1183_v51  ;;  %v1827_v51 = vld [vmem:[#allocation10 + $0x70] sm:$0xff] }
 0x569   : > { %v2790_v55 = vpack.c.bf16 %v1828_v53, %v1827_v51  ;;  %v1971_v51 = vld [vmem:[#allocation11 + $0xf8] sm:$0xff] }
 0x579   : > { %1505 = vrot.lane.b32.xlu1 %v3738_v32, %s3286_s20  ;;  %s650_s20 = scalar_lea.vmem [#allocation14], %s2348_s10  ;;  %s3195_s10 = sshll.u32 %s3288_s0, 4  ;;  %s3196_s10 = int_to_ptr.vmem [resolvable:$false] %s3195_s10 }
 0x57d   : > { %1661 = vrot.lane.b32.xlu1 %v3707_v54, %s3287_s8  ;;  %v1094_v54 = vld [vmem:[#allocation10] sm:$0xff] }
 0x57e   : > { %v2775_v2 = vpack.c.bf16 %v1095_v63, %v1094_v54 }
 0x5f5   : > { %v1185_v52 = vpop.xlane.xlu1 %1184 }
 0x5f6   : > { %2979 = vrcp.f32 %v1185_v52 }
 0x5f9   : > { %v1506_v10 = vpop.permute.xlu1 %1505 }
 0x5fd   : > { %v1662_v31 = vpop.permute.xlu1 %1661 }
 0x600   : > { %v2980_v56 = vpop.eup %2979 }
 0x601   : > { %v1187_v59 = vmul.f32 %v2980_v56, %v2978_v49  ;;  %v1826_v49 = vld [vmem:[#allocation10 + $0x68] sm:$0xff] }
 0x602   : > { %v2787_v52 = vpack.c.bf16 %v1826_v49, %v1825_v48  ;;  %v1966_v48 = vld [vmem:[#allocation11 + $0xd0] sm:$0xff]  ;;  %v1969_v49 = vld [vmem:[#allocation11 + $0xe8] sm:$0xff] }
 0x603   : > { %2630 = vmatmul.mubr.msk.f32.vlgmr.msra.gmra.mrb[8].mxu1 %vm1009_vm2, %v1187_v59  ;;  %v2820_v53 = vpack.c.bf16 %v1971_v51, %v1969_v49 }
 0x604   : > { %2770 = vmatpush3.bf16.msra.mxu1 %v2769_v58  ;;  %2640 = vmatprep.mubr.msk.f32.mxu1 %vm3283_vm0, %v3284_v1 }
 0x605   : > { %2771 = vmatprep.subr.bf16.mxu1 %v3282_v0 }
 0x608   : > { %2773 = vmatpush3.bf16.msra.mxu1 %v2772_v62 }
 0x609   : > { %2774 = vmatprep.subr.bf16.mxu1 %v3282_v0 }
 0x6d6   : > { %v1261_v5 = vpop.f32.mrb[8].mxu1 }
 0x6d7   : > { %v2631_v6 = vpop.f32.mrb[9].mxu1  ;;  %2641 = vmatmul.mubr.msk.f32.vlgmr.msra.gmra.mrb[10].mxu1 %vm931_vm1, %v1261_v5 }
 0x6d8   : > { %2776 = vmatpush3.bf16.msra.mxu1 %v2775_v2  ;;  %2651 = vmatprep.mubr.msk.f32.mxu1 %vm3283_vm0, %v3284_v1  ;;  %v1941_v6 = vld [vmem:[#allocation11 + $0x8] sm:$0xff] }
 0x6d9   : > { %2777 = vmatprep.subr.bf16.mxu1 %v3282_v0 }
 0x6dc   : > { %2779 = vmatpush3.bf16.msra.mxu1 %v2778_v7  ;;  %v1943_v7 = vld [vmem:[#allocation11 + $0x18] sm:$0xff] }
 0x6dd   : > { %2654 = vmatprep.subr.mxu1 %v3284_v1 }
 0x6df   : > { %2652 = vmatmul.mubr.msk.f32.vlgmr.msra.gmra.mrb[12].mxu1 %vm931_vm1, %v1090_v39 }
 0x6e0   : > { %2656 = vmatprep.mubr.msk.f32.mxu1 %vm3283_vm0, %v3284_v1 }
 0x6e5   : > { %2655 = vmatpush3.xpose.msk.msra.mxu1 %vm931_vm1, %v1418_v8  ;;  %v1940_v8 = vld [vmem:[#allocation11] sm:$0xff] }
 0x6e6   : > { %2659 = vmatprep.subr.mxu1 %v3284_v1 }
 0x6e8   : > { %2657 = vmatmul.mubr.msk.f32.vlgmr.msra.gmra.mrb[14].mxu1 %vm931_vm1, %v1416_v9  ;;  %v2792_v9 = vpack.c.bf16 %v1943_v7, %v1941_v6  ;;  %v2078_v6 = vld [vmem:[#allocation13 + $0xa8] sm:$0xff] }
 0x6e9   : > { %2660 = vmatpush3.msra.mxu1 %v1506_v10  ;;  %2661 = vmatprep.mubr.msk.f32.mxu1 %vm3283_vm0, %v3284_v1  ;;  %v1945_v10 = vld [vmem:[#allocation11 + $0x28] sm:$0xff] }
 0x6ea   : > { %2675 = vmatprep.subr.mxu1 %v3284_v1 }
 0x7aa   : > { %v1338_v11 = vpop.f32.mrb[10].mxu1 }
 0x7ab   : > { %v2642_v12 = vpop.f32.mrb[11].mxu1 }
 0x7b2   : > { %v1411_v13 = vpop.f32.mrb[12].mxu1 }
 0x7b3   : > { %v3779_v14 = vadd.f32 %v1411_v13, %v1338_v11  ;;  %v2653_v15 = vpop.f32.mrb[13].mxu1  ;;  %v1947_v11 = vld [vmem:[#allocation11 + $0x38] sm:$0xff] }
 0x7b4   : > { %v2796_v13 = vpack.c.bf16 %v1947_v11, %v1945_v10  ;;  %v1946_v15 = vld [vmem:[#allocation11 + $0x30] sm:$0xff]  ;;  %v2080_v11 = vld [vmem:[#allocation13 + $0xb8] sm:$0xff] }
 0x7b5   : > { %v2079_v10 = vld [vmem:[#allocation13 + $0xb0] sm:$0xff] }
 0x7bb   : > { %v1489_v16 = vpop.f32.mrb[14].mxu1 }
 0x7bc   : > { %v1493_v17 = vmul.f32 0.17677669, %v1489_v16  ;;  %v2658_v18 = vpop.f32.mrb[15].mxu1  ;;  %v1949_v16 = vld [vmem:[#allocation11 + $0x48] sm:$0xff] }
 0x7be   : > { %v1494_v19 = vsel %vm1009_vm2, %v1493_v17, -inf }
 0x7bf   : > { %1495 = vmax.xlane.f32.xlu0 %v1494_v19 }
 0x84c   : > { %v1496_v20 = vpop.xlane.xlu0 %1495 }
 0x84d   : > { %v1497_v21 = vsub.f32 %v1493_v17, %v1496_v20  ;;  %v1951_v17 = vld [vmem:[#allocation11 + $0x58] sm:$0xff]  ;;  %v1950_v20 = vld [vmem:[#allocation11 + $0x50] sm:$0xff] }
 0x84e   : > { %v2800_v19 = vpack.c.bf16 %v1951_v17, %v1949_v16  ;;  %v2081_v16 = vld [vmem:[#allocation13 + $0xc0] sm:$0xff]  ;;  %v2082_v17 = vld [vmem:[#allocation13 + $0xc8] sm:$0xff] }
 0x84f   : > { %v1498_v22 = vmul.f32 1.442695, %v1497_v21 }
 0x851   : > { %2981 = vpow2.f32 %v1498_v22 }
 0x85b   : > { %v2982_v23 = vpop.eup %2981 }
 0x85c   : > { %v1500_v24 = vsel %vm1009_vm2, %v2982_v23, 0.0 }
 0x85d   : > { %1501 = vadd.xlane.f32.xlu1 %v1500_v24 }
 0x86e   : > { %1659 = vrot.lane.b32.xlu1 %v3709_v57, %s3287_s8 }
 0x8ea   : > { %v1502_v33 = vpop.xlane.xlu1 %1501 }
 0x8eb   : > { %2983 = vrcp.f32 %v1502_v33  ;;  %v1957_v33 = vld [vmem:[#allocation11 + $0x88] sm:$0xff] }
 0x8ee   : > { %v1660_v57 = vpop.permute.xlu1 %1659 }
 0x8f5   : > { %v2984_v34 = vpop.eup %2983 }
 0x8f6   : > { %v1504_v35 = vmul.f32 %v2984_v34, %v2982_v23  ;;  %v1959_v34 = vld [vmem:[#allocation11 + $0x98] sm:$0xff] }
 0x8f8   : > { %2662 = vmatmul.mubr.msk.f32.vlgmr.msra.gmra.mrb[16].mxu1 %vm1009_vm2, %v1504_v35  ;;  %v2808_v35 = vpack.c.bf16 %v1959_v34, %v1957_v33 }
 0x8f9   : > { %2676 = vmatpush3.xpose.msk.msra.mxu1 %vm931_vm1, %v1662_v31  ;;  %2677 = vmatprep.mubr.msk.f32.mxu1 %vm3283_vm0, %v3284_v1  ;;  %v2806_v31 = vpack.c.bf16 %v1954_v30, %v1952_v29  ;;  %v2086_v29 = vld [vmem:[#allocation13 + $0xe8] sm:$0xff]  ;;  %v2846_v30 = vpack.c.bf16 %v2068_v27, %v2067_v26 }
 0x8fa   : > { %2680 = vmatprep.subr.mxu1 %v3284_v1 }
 0x8fc   : > { %2678 = vmatmul.mubr.msk.f32.vlgmr.msra.gmra.mrb[18].mxu1 %vm931_vm1, %v1660_v57  ;;  %v1956_v57 = vld [vmem:[#allocation11 + $0x80] sm:$0xff] }
 0x8fd   : > { %2682 = vmatprep.mubr.msk.f32.mxu1 %vm3283_vm0, %v3284_v1 }
 0x9cb   : > { %v1577_v36 = vpop.f32.mrb[16].mxu1 }
 0x9cc   : > { %v2663_v37 = vpop.f32.mrb[17].mxu1  ;;  %2673 = vmatmul.mubr.msk.f32.vlgmr.msra.gmra.mrb[4].mxu0 %vm931_vm1, %v1577_v36  ;;  %v1958_v36 = vld [vmem:[#allocation11 + $0x90] sm:$0xff] }
 0x9cd   : > { %2693 = vmatprep.mubr.msk.f32.mxu0 %vm3283_vm0, %v3284_v1  ;;  %2788 = vmatpush3.bf16.msra.mxu0 %v2787_v52  ;;  %v1961_v37 = vld [vmem:[#allocation11 + $0xa8] sm:$0xff] }
 0x9ce   : > { %2789 = vmatprep.subr.bf16.mxu0 %v3282_v0  ;;  %v2375_v0 = vld [vmem:[%s3947_s12] ss:$0 sm:$0xff]  ;;  %s3951_s12 = sld [smem:[#allocation28_spill]] }
 0x9cf   : > { %v1733_v38 = vpop.f32.mrb[18].mxu1 }
 0x9d0   : > { %v1737_v39 = vmul.f32 0.17677669, %v1733_v38  ;;  %v2679_v40 = vpop.f32.mrb[19].mxu1  ;;  %v2810_v38 = vpack.c.bf16 %v1958_v36, %v1956_v57  ;;  %v2376_v36 = vld [vmem:[%s3948_s23] ss:$0 sm:$0xff]  ;;  %s3952_s23 = sld [smem:[#allocation29_spill]] }
 0x9d1   : > { %2791 = vmatpush3.bf16.msra.mxu0 %v2790_v55  ;;  %v1960_v40 = vld [vmem:[#allocation11 + $0xa0] sm:$0xff] }
 0x9d2   : > { %v1738_v41 = vsel %vm1009_vm2, %v1737_v39, -inf  ;;  %v1968_v55 = vld [vmem:[#allocation11 + $0xe0] sm:$0xff] }
 0x9d3   : > { %1739 = vmax.xlane.f32.xlu0 %v1738_v41  ;;  %v1962_v41 = vld [vmem:[#allocation11 + $0xb0] sm:$0xff] }
 0x9e9   : > { %1749 = vrot.lane.b32.xlu0 %v3738_v32, %s3287_s8  ;;  %s3950_s8 = sld [smem:[#allocation27_spill]] }
 0xa60   : > { %v1740_v42 = vpop.xlane.xlu0 %1739 }
 0xa61   : > { %v1741_v43 = vsub.f32 %v1737_v39, %v1740_v42  ;;  %v1963_v39 = vld [vmem:[#allocation11 + $0xb8] sm:$0xff] }
 0xa62   : > { %v2812_v42 = vpack.c.bf16 %v1963_v39, %v1961_v37 }
 0xa63   : > { %v1742_v44 = vmul.f32 1.442695, %v1741_v43  ;;  %v1965_v43 = vld [vmem:[#allocation11 + $0xc8] sm:$0xff] }
 0xa64   : > { %v1750_v45 = vpop.permute.xlu0 %1749 }
 0xa65   : > { %2985 = vpow2.f32 %v1742_v44  ;;  %2681 = vmatpush3.msra.mxu1 %v1750_v45  ;;  %v1967_v44 = vld [vmem:[#allocation11 + $0xd8] sm:$0xff]  ;;  %v2814_v45 = vpack.c.bf16 %v1962_v41, %v1960_v40  ;;  %v2069_v41 = vld [vmem:[#allocation13 + $0x60] sm:$0xff] }
 0xa66   : > { %2793 = vmatprep.subr.bf16.mxu1 %v2792_v9  ;;  %v2061_v9 = vld [vmem:[#allocation13 + $0x20] sm:$0xff] }
 0xa6f   : > { %v2986_v46 = vpop.eup %2985 }
 0xa70   : > { %v1744_v47 = vsel %vm1009_vm2, %v2986_v46, 0.0 }
 0xa71   : > { %1745 = vadd.xlane.f32.xlu1 %v1744_v47  ;;  %v1964_v47 = vld [vmem:[#allocation11 + $0xc0] sm:$0xff] }
 0xa72   : > { %v2818_v52 = vpack.c.bf16 %v1966_v48, %v1964_v47  ;;  %v2071_v47 = vld [vmem:[#allocation13 + $0x70] sm:$0xff]  ;;  %v2072_v48 = vld [vmem:[#allocation13 + $0x78] sm:$0xff] }
 0xa73   : > { %v2854_v49 = vpack.c.bf16 %v2072_v48, %v2071_v47 }
 0xa9f   : > { %v1654_v32 = vpop.f32.mrb[4].mxu0 }
 0xaa0   : > { %v1658_v56 = vadd.f32 %v1654_v32, %v3779_v14  ;;  %v2674_v58 = vpop.f32.mrb[5].mxu0  ;;  %v1944_v14 = vld [vmem:[#allocation11 + $0x20] sm:$0xff]  ;;  %v1970_v32 = vld [vmem:[#allocation11 + $0xf0] sm:$0xff] }
 0xaa1   : > { %v2798_v18 = vpack.c.bf16 %v1946_v15, %v1944_v14  ;;  %v2073_v58 = vld [vmem:[#allocation13 + $0x80] sm:$0xff]  ;;  %v2063_v14 = vld [vmem:[#allocation13 + $0x30] sm:$0xff]  ;;  %v2064_v15 = vld [vmem:[#allocation13 + $0x38] sm:$0xff] }
 0xafe   : > { %v1746_v59 = vpop.xlane.xlu1 %1745 }
 0xaff   : > { %2987 = vrcp.f32 %v1746_v59  ;;  %v2074_v59 = vld [vmem:[#allocation13 + $0x88] sm:$0xff] }
 0xb09   : > { %v2988_v60 = vpop.eup %2987 }
 0xb0a   : > { %v1748_v61 = vmul.f32 %v2988_v60, %v2986_v46  ;;  %v2816_v46 = vpack.c.bf16 %v1967_v44, %v1965_v43  ;;  %v2057_v60 = vld [vmem:[#allocation13] sm:$0xff]  ;;  %v2087_v44 = vld [vmem:[#allocation13 + $0xf0] sm:$0xff] }
 0xb0c   : > { %2683 = vmatmul.mubr.msk.f32.vlgmr.msra.gmra.mrb[20].mxu1 %vm1009_vm2, %v1748_v61  ;;  %v2824_v61 = vpack.c.bf16 %v2074_v59, %v2073_v58 }
 0xb0d   : > { %2048 = vmatprep.mubr.f32.mxu1 %v3284_v1  ;;  %v1942_v1 = vld [vmem:[#allocation11 + $0x10] sm:$0xff] }
 0xb0e   : > { %v2794_v12 = vpack.c.bf16 %v1942_v1, %v1940_v8  ;;  %2825 = vmatprep.subr.bf16.mxu0 %v2824_v61  ;;  %v2062_v1 = vld [vmem:[#allocation13 + $0x28] sm:$0xff] }
 0xb10   : > { %2795 = vmatpush1.bf16.msra.mxu1 %v2794_v12  ;;  %v2834_v12 = vpack.c.bf16 %v2062_v1, %v2061_v9 }
 0xb11   : > { %2797 = vmatprep.subr.bf16.mxu1 %v2796_v13  ;;  %v2836_v13 = vpack.c.bf16 %v2080_v11, %v2079_v10 }
 0xb14   : > { %2799 = vmatpush1.bf16.msra.mxu1 %v2798_v18  ;;  %v2838_v18 = vpack.c.bf16 %v2064_v15, %v2063_v14 }
 0xb15   : > { %2801 = vmatprep.subr.bf16.mxu1 %v2800_v19  ;;  %v2840_v19 = vpack.c.bf16 %v2082_v17, %v2081_v16 }
 0xbdf   : > { %v1821_v62 = vpop.f32.mrb[20].mxu1 }
 0xbe0   : > { %v2684_v54 = vpop.f32.mrb[21].mxu1  ;;  %2694 = vmatmul.mubr.msk.f32.vlgmr.msra.gmra.mrb[6].mxu0 %vm931_vm1, %v1821_v62  ;;  %v2058_v62 = vld [vmem:[#allocation13 + $0x8] sm:$0xff] }
 0xbe1   : > { %v2075_v54 = vld [vmem:[#allocation13 + $0x90] sm:$0xff] }
 0xcb3   : > { %v1898_v63 = vpop.f32.mrb[6].mxu0 }
 0xcb4   : > { %v1902_v2 = vadd.f32 %v1898_v63, %v1658_v56  ;;  %v2695_v3 = vpop.f32.mrb[7].mxu0  ;;  %v2822_v56 = vpack.c.bf16 %v1970_v32, %v1968_v55  ;;  %v2076_v63 = vld [vmem:[#allocation13 + $0x98] sm:$0xff] }
 0xcb5   : > { %v2059_v3 = vld [vmem:[#allocation13 + $0x10] sm:$0xff] }
 0xcb6   : > { %v1910_v4 = vadd.f32 %v2375_v0, %v1902_v2  ;;  %v2826_v0 = vpack.c.bf16 %v2058_v62, %v2057_v60  ;;  %v2828_v2 = vpack.c.bf16 %v2076_v63, %v2075_v54 }
 0xcb8   : > { %v1911_v5 = vadd.f32 %v1910_v4, %v3691_v50  ;;  %v1948_v50 = vld [vmem:[#allocation11 + $0x40] sm:$0xff]  ;;  %v2060_v4 = vld [vmem:[#allocation13 + $0x18] sm:$0xff]  ;;  %2827 = vmatpush3.bf16.msra.mxu0 %v2826_v0  ;;  %v2378_v0 = vld [vmem:[%s3951_s12] ss:$0 sm:$0xff]  ;;  %s3954_s12 = sld [smem:[#allocation31_spill]] }
 0xcb9   : > { %v2802_v21 = vpack.c.bf16 %v1950_v20, %v1948_v50  ;;  %v2830_v7 = vpack.c.bf16 %v2060_v4, %v2059_v3  ;;  %2829 = vmatprep.subr.bf16.mxu0 %v2828_v2  ;;  %v2065_v50 = vld [vmem:[#allocation13 + $0x40] sm:$0xff]  ;;  %v2066_v20 = vld [vmem:[#allocation13 + $0x48] sm:$0xff] }
 0xcba   : > { %1914 = vadd.xlane.f32.xlu0 %v1911_v5 }
 0xcbb   : > { %2803 = vmatpush1.bf16.msra.mxu1 %v2802_v21  ;;  %v2083_v21 = vld [vmem:[#allocation13 + $0xd0] sm:$0xff] }
 0xcbc   : > { %2805 = vmatprep.subr.bf16.mxu1 %v2804_v28  ;;  %2831 = vmatpush3.bf16.msra.mxu0 %v2830_v7  ;;  %v2085_v28 = vld [vmem:[#allocation13 + $0xe0] sm:$0xff] }
 0xcbe   : > { %s3840_s2 = scalar_lea.hbm %s3954_s12, %s2382_s14 }
 0xcbf   : > { %2807 = vmatpush1.bf16.msra.mxu1 %v2806_v31  ;;  %v2848_v31 = vpack.c.bf16 %v2086_v29, %v2085_v28 }
 0xcc0   : > { %2809 = vmatprep.subr.bf16.mxu1 %v2808_v35 }
 0xcc3   : > { %2811 = vmatpush1.bf16.msra.mxu1 %v2810_v38  ;;  %v2377_v38 = vld [vmem:[%s3949_s17] ss:$0 sm:$0xff]  ;;  %s3953_s17 = sld [smem:[#allocation30_spill]] }
 0xcc4   : > { %2813 = vmatprep.subr.bf16.mxu1 %v2812_v42  ;;  %v2070_v42 = vld [vmem:[#allocation13 + $0x68] sm:$0xff] }
 0xcc5   : > { %v2850_v43 = vpack.c.bf16 %v2070_v42, %v2069_v41 }
 0xcc7   : > { %2815 = vmatpush1.bf16.msra.mxu1 %v2814_v45  ;;  %v2088_v45 = vld [vmem:[#allocation13 + $0xf8] sm:$0xff] }
 0xcc8   : > { %2817 = vmatprep.subr.bf16.mxu1 %v2816_v46  ;;  %v2852_v46 = vpack.c.bf16 %v2088_v45, %v2087_v44 }
 0xcc9   : > { %v2380_v15 = vld [vmem:[%s3953_s17] ss:$0 sm:$0xff] }
 0xccb   : > { %2819 = vmatpush1.bf16.msra.mxu1 %v2818_v52 }
 0xccc   : > { %2821 = vmatprep.subr.bf16.mxu1 %v2820_v53  ;;  %v1972_v53 = vld [vmem:[%s3950_s8] sm:$0x3]  ;;  %s2209_s8 = sshll.u32 %s650_s20, 4  ;;  %s3842_s8 = int_to_ptr.vmem [resolvable:$true] %s2209_s8 }
 0xccd   : > { %s3191_s16 = scalar_lea.vmem %s3842_s8, 128  ;;  %p3198_p13 = scmp.lt.s32.totalorder %s3842_s8, %s3196_s10 }
 0xcce   : > { %p3192_p6 = scmp.ne.s32.totalorder %s3842_s8, %s3191_s16 }
 0xccf   : > { %2823 = vmatpush1.bf16.msra.mxu1 %v2822_v56 }
 0xcd0   : > { %p3193_p12 = pnand %p3192_p6, %p3955_p9 }
 0xcd2   : > { %p3194_p1 = pneg %p3193_p12 }
 0xd47   : > { %v1915_v22 = vpop.xlane.xlu0 %1914 }
 0xd48   : > { %v1917_v23 = vmul.f32 0.0078125, %v1915_v22  ;;  %v2084_v22 = vld [vmem:[#allocation13 + $0xd8] sm:$0xff] }
 0xd4a   : > { %v3811_v24 = vsub.f32 %v1911_v5, %v1917_v23  ;;  %v2077_v5 = vld [vmem:[#allocation13 + $0xa0] sm:$0xff]  ;;  %v2842_v23 = vpack.c.bf16 %v2066_v20, %v2065_v50 }
 0xd4b   : > { %v2832_v8 = vpack.c.bf16 %v2078_v6, %v2077_v5 }
 0xd4c   : > { %v1919_v25 = vmul.f32 %v3811_v24, %v3811_v24 }
 0xd4d   : > { %2833 = vmatprep.subr.bf16.mxu0 %v2832_v8 }
 0xd4e   : > { %1920 = vadd.xlane.f32.xlu1 %v1919_v25  ;;  %2835 = vmatpush3.bf16.msra.mxu0 %v2834_v12  ;;  %v2844_v25 = vpack.c.bf16 %v2084_v22, %v2083_v21 }
 0xd4f   : > { %2837 = vmatprep.subr.bf16.mxu0 %v2836_v13  ;;  %v2379_v13 = vld [vmem:[%s3952_s23] ss:$0 sm:$0xff]  ;;  %s3197_s23 = scalar_lea.vmem %s3196_s10, 256 }
 0xd50   : > { %p3199_p0 = scmp.lt.s32.totalorder %s3197_s23, %s3191_s16 }
 0xd52   : > { %2839 = vmatpush3.bf16.msra.mxu0 %v2838_v18  ;;  %p3200_p2 = por %p3199_p0, %p3198_p13 }
 0xd53   : > { %2841 = vmatprep.subr.bf16.mxu0 %v2840_v19 }
 0xd54   : > { %p3201_p3 = pnand %p3200_p2, %p3194_p1 }
 0xd56   : > { %2843 = vmatpush3.bf16.msra.mxu0 %v2842_v23 }
 0xd57   : > { %2845 = vmatprep.subr.bf16.mxu0 %v2844_v25 }
 0xd5a   : > { %2847 = vmatpush3.bf16.msra.mxu0 %v2846_v30 }
 0xd5b   : > { %2849 = vmatprep.subr.bf16.mxu0 %v2848_v31 }
 0xd5e   : > { %2851 = vmatpush3.bf16.msra.mxu0 %v2850_v43 }
 0xd5f   : > { %2853 = vmatprep.subr.bf16.mxu0 %v2852_v46 }
 0xd62   : > { %2855 = vmatpush3.bf16.msra.mxu0 %v2854_v49 }
 0xddb   : > { %v1921_v33 = vpop.xlane.xlu1 %1920 }
 0xddc   : > { %v1922_v34 = vmul.f32 0.0078125, %v1921_v33 }
 0xdde   : > { %v1923_v35 = vadd.f32 1e-05, %v1922_v34 }
 0xde0   : > { %2989 = vrsqrt.f32 %v1923_v35 }
 0xdea   : > { %v2990_v57 = vpop.eup %2989 }
 0xdeb   : > { %v1925_v37 = vmul.f32 %v2990_v57, %v3811_v24  ;;  %v1974_v24 = vlaneseq }
 0xded   : > { %v1932_v39 = vmul.f32 %v2376_v36, %v1925_v37  ;;  %v1975_v51 = vshrl.u32 %v1974_v24, 7 }
 0xdef   : > { %v1939_v40 = vadd.f32 %v2377_v38, %v1932_v39  ;;  %v1976_v52 = vsub.s32 0, %v1975_v51  ;;  %v1980_v55 = vsub.s32 1, %v1975_v51 }
 0xdf1   : > { %2049 = vmatmul.mubr.f32.vlgmr.msra.gmra.mrb[22].mxu1 %v1939_v40  ;;  %v1977_v32 = vrot.slane %v1972_v53, %v1976_v52  ;;  %v1981_v56 = vrot.slane %v1972_v53, %v1980_v55 }
 0xec4   : > { %v2050_v58 = vpop.f32.mrb[22].mxu1 }
 0xec5   : > { %v2051_v59 = vadd.f32 %v2050_v58, %v1977_v32  ;;  %v2052_v60 = vpop.f32.mrb[23].mxu1 }
 0xec6   : > { %v2053_v61 = vadd.f32 %v2052_v60, %v1981_v56 }
 0xec7   : > { %v2055_v54 = vmax.f32 %v2051_v59, 0.0 }
 0xec8   : > { %v2056_v62 = vmax.f32 %v2053_v61, 0.0 }
 0xeca   : > { %2160 = vmatprep.mubr.f32.mxu0 %v2056_v62 }
 0xecb   : > { %2161 = vmatmul.mubr.f32.vlgmr.msra.gmra.mrb[8].mxu0 %v2055_v54 }
 0xf9e   : > { %v2504_v63 = vpop.f32.mrb[8].mxu0 }
 0xf9f   : > { %v2505_v2 = vpop.f32.mrb[9].mxu0 }
 0xfa0   : > { %v2506_v3 = vadd.f32 %v2505_v2, %v2504_v63 }
 0xfa2   : > { %v2163_v4 = vadd.f32 %v2506_v3, %v2378_v0 }
 0xfa4   : > { %v2166_v5 = vadd.f32 %v2163_v4, %v1939_v40 }
 0xfa6   : > { %2169 = vadd.xlane.f32.xlu1 %v2166_v5 }
0x1033   : > { %v2170_v6 = vpop.xlane.xlu1 %2169 }
0x1034   : > { %v2171_v7 = vmul.f32 0.0078125, %v2170_v6 }
0x1036   : > { %v2172_v8 = vsub.f32 %v2166_v5, %v2171_v7 }
0x1038   : > { %v2173_v9 = vmul.f32 %v2172_v8, %v2172_v8 }
0x103a   : > { %2174 = vadd.xlane.f32.xlu1 %v2173_v9 }
0x10c7   : > { %v2175_v1 = vpop.xlane.xlu1 %2174 }
0x10c8   : > { %v2176_v10 = vmul.f32 0.0078125, %v2175_v1 }
0x10ca   : > { %v2177_v11 = vadd.f32 1e-05, %v2176_v10 }
0x10cc   : > { %2991 = vrsqrt.f32 %v2177_v11 }
0x10d6   : > { %v2992_v12 = vpop.eup %2991 }
0x10d7   : > { %v2179_v14 = vmul.f32 %v2992_v12, %v2172_v8 }
0x10d9   : > { %v2186_v16 = vmul.f32 %v2379_v13, %v2179_v14 }
0x10db   : > { %v2193_v17 = vadd.f32 %v2380_v15, %v2186_v16 }
0x10dd   : > { %2194 = vst [vmem:[%s650_s20] sm:$0xff] %v2193_v17 }
0x10de   : > { %3204 = shalt.err (!%p3201_p3)
}
0x10df   : > { %s3205_s19 = scalar_lea.hbm %s3840_s2, 128  ;;  %s3209_s17 = scalar_lea.hbm %s3954_s12, 256 }
0x10e0   : > { %p3206_p4 = scmp.ne.s32.totalorder %s3840_s2, %s3205_s19  ;;  %p3210_p8 = scmp.lt.u32.totalorder %s3840_s2, %s3954_s12 }
0x10e1   : > { %p3211_p5 = scmp.lt.u32.totalorder %s3209_s17, %s3205_s19  ;;  %p3213_p6 = scmp.lt.u32.totalorder %s3205_s19, %s3840_s2 }
0x10e2   : > { %p3207_p10 = pnand %p3206_p4, %p3955_p9 }
0x10e3   : > { %p3212_p7 = por %p3211_p5, %p3210_p8 }
0x10e4   : > { %p3208_p11 = pneg %p3207_p10 }
0x10e5   : > { %p3214_p12 = por %p3213_p6, %p3212_p7 }
0x10e7   : > { %p3215_p1 = pnand %p3214_p12, %p3208_p11 }
0x10e9   : > { %3218 = shalt.err (!%p3215_p1)
}
0x10ea   : > { %2882 = dma.vmem_to_hbm [thread:$0]  (%p3955_p9), %s3842_s8, 128, %s3840_s2, %s2196_s30  }
0x10eb PF: > { %s2221_s9 = sand.u32 1, %s3257_s24   ;;  %p3956_p13 = scmp.ne.s32.totalorder %s3936_s29, 0 }
0x10ec   : > { %p3957_p0 = scmp.ge.s32.totalorder %s3269_s27, 2  ;;  %s2222_s28 = scalar_lea.sflag [#allocation4], %s2221_s9 }
0x10ee   : > { %p2908_p2 = pnand %p3957_p0, %p3956_p13 }
0x10f0   : > { %3252 = dma.done.wait (!%p2908_p2), %s2222_s28, 128  }
0x10f1   : > { %3254 = vsyncadd (!%p2908_p2), %s2222_s28, 4294967168  ;;  %p33_p3 = scmp.ge.s32.totalorder %s3570_s18, 4   ;;  %s3958_s24 = smov %s3261_s25 }
0x10f2   : > { %s3959_s25 = smov %s3265_s26  ;;  %s3960_s26 = smov %s3581_s21 }
0x10f3   : > { %s3961_s27 = smov %s3570_s18  ;;  %35 = sbr.rel (!%p33_p3) target bundleno = 21 (0x15), region = 157 }
0x10fa   :  { %2227 = vsyncpa [#allocation3], 1 }
0x10fb   :  { %2229 = vsyncpa [#allocation3 + $0x1], 1 }
0x10fc   :  { %2230 = vsyncpa [#allocation6], 1 }
0x10fd   :  { %2231 = vsyncpa [#allocation9], 1 }
0x10fe   :  { %2232 = vsyncpa [#allocation12], 1 }
0x10ff   :  { %2233 = vsyncpa [#allocation4], 1 }
0x1100   :  { %2235 = vsyncpa [#allocation4 + $0x1], 1 }

</bundles_post_ra>
